<compile_context>
chip_gen: v6e
topology: v6e:2x2x1
jax: 0.10.0
libtpu: 0.0.40
codegen_flags: <defaults>
</compile_context>

<pallas_src>
import jax
import jax.numpy as jnp
import numpy as np
from jax import lax
from jax.experimental import pallas as pl
from jax.experimental.pallas import tpu as pltpu


def _round_up(x, m):
    return (x + m - 1) // m * m


def _pad_to(a, shape):
    return jnp.pad(a, [(0, s - d) for d, s in zip(a.shape, shape)])


def _pick_chunk(s):
    for c in (256, 128, 64, 32, 16, 8):
        if s % c == 0:
            return c
    return s


def _row_tile(n):
    if n <= 1024:
        return n
    for t in (1024, 512, 256, 128, 8):
        if n % t == 0:
            return t
    return n


# --------------------- hoisted, fused input projection -----------------------
def input_proj_kernel(x_ref, w_ref, b_ref, gi_ref):
    # x: (tn, D);  w: (D, 3*Hp);  b: (1, 3*Hp);  gi: (tn, 3*Hp)  (lane dense)
    gi_ref[...] = (jnp.dot(x_ref[...], w_ref[...],
                           preferred_element_type=jnp.float32) + b_ref[...])


def input_projection(x2d, w_i3, b_i3):
    n, d = x2d.shape
    h3 = w_i3.shape[-1]
    tn = _row_tile(n)                     # divides n (n is a multiple of 8)
    return pl.pallas_call(
        input_proj_kernel,
        out_shape=jax.ShapeDtypeStruct((n, h3), jnp.float32),
        grid_spec=pltpu.PrefetchScalarGridSpec(
            num_scalar_prefetch=0,
            grid=(n // tn,),
            in_specs=[
                pl.BlockSpec((tn, d), lambda i: (i, 0)),
                pl.BlockSpec((d, h3), lambda i: (0, 0)),
                pl.BlockSpec((1, h3), lambda i: (0, 0)),
            ],
            out_specs=pl.BlockSpec((tn, h3), lambda i: (i, 0)),
        ),
        compiler_params=pltpu.CompilerParams(
            dimension_semantics=("parallel",),
            vmem_limit_bytes=32 * 1024 * 1024),
    )(x2d, w_i3, b_i3)


# ------------- GRU recurrence (time-chunked) + per-chunk linear2 --------------
def gru_kernel(gi_ref, whh_ref, bhn_ref, w2_ref, b2_ref, rnn_ref, out2_ref, h_ref):
    # gi_ref : (K, tb, 3*Hp)  precomputed x-projection (b_hr/b_hz folded in)
    # whh_ref: (Hp, 3*Hp)     bhn_ref: (1, Hp)
    # w2_ref : (Hp, Op)       b2_ref : (1, Op)
    # rnn_ref: (K, tb, Hp)    out2_ref: (K, tb, Op)
    # h_ref  : (tb, Hp)       persistent hidden state across time chunks
    @pl.when(pl.program_id(1) == 0)
    def _():
        h_ref[...] = jnp.zeros_like(h_ref)

    k_steps, tb, hp = rnn_ref.shape
    bhn = bhn_ref[...]

    def step(k, h):
        gi = gi_ref[k]                                       # (tb, 3*Hp)
        # single fused h-matmul for all three gates
        hh = jnp.dot(h, whh_ref[...], preferred_element_type=jnp.float32)
        r = jax.nn.sigmoid(gi[:, :hp] + hh[:, :hp])
        z = jax.nn.sigmoid(gi[:, hp:2 * hp] + hh[:, hp:2 * hp])
        n = jnp.tanh(gi[:, 2 * hp:] + r * (hh[:, 2 * hp:] + bhn))
        h_new = (1.0 - z) * n + z * h
        rnn_ref[k] = h_new
        return h_new

    h_ref[...] = lax.fori_loop(0, k_steps, step, h_ref[...],
                               unroll=min(8, k_steps))

    # fused linear2, hoisted out of the serial loop: one lane-dense matmul
    # over the whole chunk ((K*tb, Hp) @ (Hp, Op)).
    hs = rnn_ref[...].reshape(k_steps * tb, hp)
    o2 = jnp.dot(hs, w2_ref[...], preferred_element_type=jnp.float32) + b2_ref[...]
    out2_ref[...] = o2.reshape(k_steps, tb, out2_ref.shape[-1])


def gru_linear2(gi, w_h3, b_hn, w2, b2, *, chunk, tb):
    s, b_pad, h3 = gi.shape
    hp = w_h3.shape[0]
    op = w2.shape[-1]
    return pl.pallas_call(
        gru_kernel,
        out_shape=(jax.ShapeDtypeStruct((s, b_pad, hp), jnp.float32),
                   jax.ShapeDtypeStruct((s, b_pad, op), jnp.float32)),
        grid_spec=pltpu.PrefetchScalarGridSpec(
            num_scalar_prefetch=0,
            grid=(b_pad // tb, s // chunk),
            in_specs=[
                pl.BlockSpec((chunk, tb, h3), lambda bi, c: (c, bi, 0)),
                pl.BlockSpec((hp, h3), lambda bi, c: (0, 0)),
                pl.BlockSpec((1, hp), lambda bi, c: (0, 0)),
                pl.BlockSpec((hp, op), lambda bi, c: (0, 0)),
                pl.BlockSpec((1, op), lambda bi, c: (0, 0)),
            ],
            out_specs=(pl.BlockSpec((chunk, tb, hp), lambda bi, c: (c, bi, 0)),
                       pl.BlockSpec((chunk, tb, op), lambda bi, c: (c, bi, 0))),
            scratch_shapes=[pltpu.VMEM((tb, hp), jnp.float32)],
        ),
        compiler_params=pltpu.CompilerParams(
            dimension_semantics=("parallel", "arbitrary"),
            vmem_limit_bytes=32 * 1024 * 1024),
    )(gi, w_h3, b_hn, w2, b2)


# -------------------- attention + linear1 head (batch-tiled) ------------------
def attn_head_kernel(rnn_ref, wattn_ref, w1_ref, b1_ref, out1_ref):
    rnn = rnn_ref[...]                                       # (T, tb, Hp)
    t = rnn.shape[0]
    last = rnn[t - 1]                                        # (tb, Hp)

    ga = jnp.dot(last, wattn_ref[...], preferred_element_type=jnp.float32)
    # scores via VPU multiply + cross-lane reduce (MXU matvec N=1 avoided)
    scores = jnp.sum(rnn * ga[None, :, :], axis=-1, keepdims=True)  # (T, tb, 1)
    # softmax over the first T-1 timesteps: mask last position instead of a
    # ragged rnn[:, :-1] slice (keeps every tile rectangular / aligned).
    t_idx = lax.broadcasted_iota(jnp.int32, scores.shape, 0)
    scores = jnp.where(t_idx < t - 1, scores, -jnp.inf)
    m = jnp.max(scores, axis=0, keepdims=True)
    e = jnp.exp(scores - m)
    sm = e / jnp.sum(e, axis=0, keepdims=True)                       # (T, tb, 1)
    ctx = jnp.sum(sm * rnn, axis=0)                                  # (tb, Hp)

    # linear1 on concat([last, ctx]) as a split matmul (same math as concat@W1)
    o1 = (jnp.dot(last, w1_ref[0], preferred_element_type=jnp.float32)
          + jnp.dot(ctx, w1_ref[1], preferred_element_type=jnp.float32)
          + b1_ref[...])
    out1_ref[...] = jax.nn.sigmoid(o1)


def attn_head(rnn_tm, w_attn, w1, b1, *, tb):
    s, b_pad, hp = rnn_tm.shape
    op = w1.shape[-1]
    return pl.pallas_call(
        attn_head_kernel,
        out_shape=jax.ShapeDtypeStruct((b_pad, op), jnp.float32),
        grid_spec=pltpu.PrefetchScalarGridSpec(
            num_scalar_prefetch=0,
            grid=(b_pad // tb,),
            in_specs=[
                pl.BlockSpec((s, tb, hp), lambda i: (0, i, 0)),
                pl.BlockSpec((hp, hp), lambda i: (0, 0)),
                pl.BlockSpec((2, hp, op), lambda i: (0, 0, 0)),
                pl.BlockSpec((1, op), lambda i: (0, 0)),
            ],
            out_specs=pl.BlockSpec((tb, op), lambda i: (i, 0)),
        ),
        compiler_params=pltpu.CompilerParams(
            dimension_semantics=("parallel",),
            vmem_limit_bytes=32 * 1024 * 1024),
    )(rnn_tm, w_attn, w1, b1)


# ------------------------------- full forward ---------------------------------
@jax.jit
def dip_g_forward(x, params):
    b, s, d = x.shape
    h = params["w_hh"].shape[-1]
    o = params["w2"].shape[-1]
    hp = _round_up(h, 128)          # lane-dense hidden
    op = _round_up(o, 128)          # lane-dense output
    bp = _round_up(b, 8)            # sublane-dense batch

    w_ih, w_hh = params["w_ih"], params["w_hh"]
    b_ih, b_hh = params["b_ih"], params["b_hh"]

    # Fold b_hr, b_hz into the input-side bias (b_hn must stay inside r*(.)).
    b_in = b_ih.at[0].add(b_hh[0]).at[1].add(b_hh[1])
    # Fused / zero-padded weights.  Zero padding keeps padded lanes of h
    # exactly zero through the whole recurrence, so results are unchanged.
    w_i3 = jnp.concatenate([_pad_to(w_ih[g], (d, hp)) for g in range(3)], axis=1)
    b_i3 = jnp.concatenate([_pad_to(b_in[g], (1, hp)) for g in range(3)], axis=1)
    w_h3 = jnp.concatenate([_pad_to(w_hh[g], (hp, hp)) for g in range(3)], axis=1)
    b_hn = _pad_to(b_hh[2], (1, hp))
    w_attn = _pad_to(params["w_attn"], (hp, hp))
    w1 = _pad_to(params["w1"], (2, hp, op))
    b1 = _pad_to(params["b1"], (1, op))
    w2 = _pad_to(params["w2"], (hp, op))
    b2 = _pad_to(params["b2"], (1, op))

    # Time-major, batch-padded input (same permute the PyTorch module does).
    x_tm = jnp.transpose(jnp.pad(x, ((0, bp - b), (0, 0), (0, 0))), (1, 0, 2))
    x2d = x_tm.reshape(s * bp, d)

    # 1) hoisted input projection: one big lane-dense matmul pass
    gi = input_projection(x2d, w_i3, b_i3).reshape(s, bp, 3 * hp)

    # 2) GRU recurrence + per-chunk fused linear2
    chunk = _pick_chunk(s)
    tb = 8
    rnn_tm, out2_tm = gru_linear2(gi, w_h3, b_hn, w2, b2, chunk=chunk, tb=tb)

    # 3) general attention + linear1 + sigmoid
    out1 = attn_head(rnn_tm, w_attn, w1, b1, tb=tb)

    return out1[:b, :o], jnp.transpose(out2_tm, (1, 0, 2))[:b, :, :o]


# ---------------------------- pure-JAX reference -------------------------------
def dip_g_reference(x, params):
    b, s, _ = x.shape
    w_ih, w_hh = params["w_ih"], params["w_hh"]
    b_ih, b_hh = params["b_ih"], params["b_hh"]
    h_dim = w_hh.shape[-1]

    def step(h, x_t):
        r = jax.nn.sigmoid(x_t @ w_ih[0] + b_ih[0] + h @ w_hh[0] + b_hh[0])
        z = jax.nn.sigmoid(x_t @ w_ih[1] + b_ih[1] + h @ w_hh[1] + b_hh[1])
        n = jnp.tanh(x_t @ w_ih[2] + b_ih[2] + r * (h @ w_hh[2] + b_hh[2]))
        h_new = (1.0 - z) * n + z * h
        return h_new, h_new

    h0 = jnp.zeros((b, h_dim), jnp.float32)
    _, rnn_tm = jax.lax.scan(step, h0, jnp.transpose(x, (1, 0, 2)))
    rnn_out = jnp.transpose(rnn_tm, (1, 0, 2))               # (B, S, H)

    out = rnn_out[:, :-1, :]
    last = rnn_out[:, -1, :]
    ga = last @ params["w_attn"]
    scores = jnp.einsum("bth,bh->bt", out, ga)
    sm = jax.nn.softmax(scores, axis=1)
    ctx = jnp.einsum("bt,bth->bh", sm, out)
    out1 = jax.nn.sigmoid(last @ params["w1"][0] + ctx @ params["w1"][1]
                          + params["b1"])
    out2 = rnn_out @ params["w2"] + params["b2"]
    return out1, out2


# ----------------------------------- params ------------------------------------
def make_params(key, input_dim, hidden_dim, output_dim):
    ks = jax.random.split(key, 9)
    s = 1.0 / np.sqrt(hidden_dim)
    return {
        # GRU weights stored per-gate (gate order r, z, n), transposed vs PyTorch
        "w_ih": jax.random.uniform(ks[0], (3, input_dim, hidden_dim),
                                   jnp.float32, -s, s),
        "w_hh": jax.random.uniform(ks[1], (3, hidden_dim, hidden_dim),
                                   jnp.float32, -s, s),
        "b_ih": jax.random.uniform(ks[2], (3, 1, hidden_dim), jnp.float32, -s, s),
        "b_hh": jax.random.uniform(ks[3], (3, 1, hidden_dim), jnp.float32, -s, s),
        # attention_t_w ~ randn (H, H) like the PyTorch Parameter
        "w_attn": jax.random.normal(ks[4], (hidden_dim, hidden_dim), jnp.float32),
        # linear1 split into the (last, ctx) halves of the concat: (2, H, O)
        "w1": jax.random.uniform(ks[5], (2, hidden_dim, output_dim),
                                 jnp.float32, -s, s),
        "b1": jax.random.uniform(ks[6], (1, output_dim), jnp.float32, -s, s),
        "w2": jax.random.uniform(ks[7], (hidden_dim, output_dim),
                                 jnp.float32, -s, s),
        "b2": jax.random.uniform(ks[8], (1, output_dim), jnp.float32, -s, s),
    }


# ------------------------------------ main --------------------------------------
if __name__ == "__main__":
    batch, seq, input_dim, hidden_dim, output_dim = 2, 8, 16, 32, 8

    key = jax.random.PRNGKey(0)
    kx, kp = jax.random.split(key)
    x = jax.random.normal(kx, (batch, seq, input_dim), jnp.float32)
    params = make_params(kp, input_dim, hidden_dim, output_dim)

    out1, out2 = dip_g_forward(x, params)
    out1, out2 = jax.block_until_ready((out1, out2))

    ref1, ref2 = dip_g_reference(x, params)
    np.testing.assert_allclose(np.asarray(out1), np.asarray(ref1), rtol=2e-3, atol=2e-3)
    np.testing.assert_allclose(np.asarray(out2), np.asarray(ref2), rtol=2e-3, atol=2e-3)

    assert out1.shape == (batch, output_dim)
    assert out2.shape == (batch, seq, output_dim)
    print("KERNEL_OK")
</pallas_src>

<mosaic_0001>
module attributes {stable_mosaic.version = 11 : i64} {
  func.func @input_proj_kernel(%arg0: i32, %arg1: memref<64x16xf32, #tpu.memory_space<vmem>>, %arg2: memref<16x384xf32, #tpu.memory_space<vmem>>, %arg3: memref<1x384xf32, #tpu.memory_space<vmem>>, %arg4: memref<64x384xf32, #tpu.memory_space<vmem>>) attributes {dimension_semantics = [#tpu.dimension_semantics<parallel>], iteration_bounds = array<i64: 1>, scalar_prefetch = 0 : i64, scratch_operands = 0 : i64, tpu.core_type = #tpu.core_type<tc>, window_params = [{transform_indices = @transform_0, window_bounds = array<i64: 64, 16>}, {pipeline_mode = #tpu.pipeline_mode<synchronous>, transform_indices = @transform_1, window_bounds = array<i64: 16, 384>}, {pipeline_mode = #tpu.pipeline_mode<synchronous>, transform_indices = @transform_2, window_bounds = array<i64: 1, 384>}, {transform_indices = @transform_3, window_bounds = array<i64: 64, 384>}]} {
    %c0 = arith.constant 0 : index
    %c0_0 = arith.constant 0 : index
    %0 = vector.load %arg1[%c0, %c0_0] : memref<64x16xf32, #tpu.memory_space<vmem>>, vector<64x16xf32>
    %c0_1 = arith.constant 0 : index
    %c0_2 = arith.constant 0 : index
    %1 = vector.load %arg2[%c0_1, %c0_2] : memref<16x384xf32, #tpu.memory_space<vmem>>, vector<16x384xf32>
    %cst = arith.constant dense<0.000000e+00> : vector<64x384xf32>
    %2 = tpu.matmul %0, %1, %cst {dimension_numbers = #tpu.dot_dimension_numbers<[1], [0], [0], [1], [0, 0, 1, 1], [], []>} : vector<64x16xf32>, vector<16x384xf32>, vector<64x384xf32> -> vector<64x384xf32>
    %c0_3 = arith.constant 0 : index
    %c0_4 = arith.constant 0 : index
    %3 = vector.load %arg3[%c0_3, %c0_4] : memref<1x384xf32, #tpu.memory_space<vmem>>, vector<1x384xf32>
    %4 = vector.broadcast %3 : vector<1x384xf32> to vector<64x384xf32>
    %5 = arith.addf %2, %4 : vector<64x384xf32>
    %c0_5 = arith.constant 0 : index
    %c0_6 = arith.constant 0 : index
    %6 = vector.load %arg4[%c0_5, %c0_6] : memref<64x384xf32, #tpu.memory_space<vmem>>, vector<64x384xf32>
    tpu.vector_store %arg4[%c0_5, %c0_6], %5 {strides = array<i32>} : memref<64x384xf32, #tpu.memory_space<vmem>>, vector<64x384xf32>,
    return
  }
  func.func @transform_0(%arg0: i32) -> (i32, i32) {
    %c0_i32 = arith.constant 0 : i32
    %c0_i32_0 = arith.constant 0 : i32
    return %arg0, %c0_i32 : i32, i32
  }
  func.func @transform_1(%arg0: i32) -> (i32, i32) {
    %c0_i32 = arith.constant 0 : i32
    %c0_i32_0 = arith.constant 0 : i32
    %c0_i32_1 = arith.constant 0 : i32
    return %c0_i32, %c0_i32_0 : i32, i32
  }
  func.func @transform_2(%arg0: i32) -> (i32, i32) {
    %c0_i32 = arith.constant 0 : i32
    %c0_i32_0 = arith.constant 0 : i32
    %c0_i32_1 = arith.constant 0 : i32
    return %c0_i32, %c0_i32_0 : i32, i32
  }
  func.func @transform_3(%arg0: i32) -> (i32, i32) {
    %c0_i32 = arith.constant 0 : i32
    %c0_i32_0 = arith.constant 0 : i32
    return %arg0, %c0_i32 : i32, i32
  }
}

module attributes {stable_mosaic.version = 11 : i64} {
  func.func @gru_kernel(%arg0: i32, %arg1: i32, %arg2: memref<8x8x384xf32, #tpu.memory_space<vmem>>, %arg3: memref<128x384xf32, #tpu.memory_space<vmem>>, %arg4: memref<1x128xf32, #tpu.memory_space<vmem>>, %arg5: memref<128x128xf32, #tpu.memory_space<vmem>>, %arg6: memref<1x128xf32, #tpu.memory_space<vmem>>, %arg7: memref<8x8x128xf32, #tpu.memory_space<vmem>>, %arg8: memref<8x8x128xf32, #tpu.memory_space<vmem>>, %arg9: memref<8x128xf32, #tpu.memory_space<vmem>>) attributes {dimension_semantics = [#tpu.dimension_semantics<parallel>, #tpu.dimension_semantics<arbitrary>], iteration_bounds = array<i64: 1, 1>, scalar_prefetch = 0 : i64, scratch_operands = 1 : i64, tpu.core_type = #tpu.core_type<tc>, window_params = [{transform_indices = @transform_0, window_bounds = array<i64: 8, 8, 384>}, {pipeline_mode = #tpu.pipeline_mode<synchronous>, transform_indices = @transform_1, window_bounds = array<i64: 128, 384>}, {pipeline_mode = #tpu.pipeline_mode<synchronous>, transform_indices = @transform_2, window_bounds = array<i64: 1, 128>}, {pipeline_mode = #tpu.pipeline_mode<synchronous>, transform_indices = @transform_3, window_bounds = array<i64: 128, 128>}, {pipeline_mode = #tpu.pipeline_mode<synchronous>, transform_indices = @transform_4, window_bounds = array<i64: 1, 128>}, {transform_indices = @transform_5, window_bounds = array<i64: 8, 8, 128>}, {transform_indices = @transform_6, window_bounds = array<i64: 8, 8, 128>}]} {
    %c0_i32 = arith.constant 0 : i32
    %0 = arith.cmpi eq, %arg1, %c0_i32 : i32
    %1 = arith.extui %0 : i1 to i32
    %c0_i32_0 = arith.constant 0 : i32
    %2 = arith.cmpi ne, %1, %c0_i32_0 : i32
    scf.if %2 {
      %cst_97 = arith.constant 0.000000e+00 : f32
      %311 = vector.broadcast %cst_97 : f32 to vector<8x128xf32>
      %c0_98 = arith.constant 0 : index
      %c0_99 = arith.constant 0 : index
      %312 = vector.load %arg9[%c0_98, %c0_99] : memref<8x128xf32, #tpu.memory_space<vmem>>, vector<8x128xf32>
      tpu.vector_store %arg9[%c0_98, %c0_99], %311 {strides = array<i32>} : memref<8x128xf32, #tpu.memory_space<vmem>>, vector<8x128xf32>,
    } else {
    }
    %c0 = arith.constant 0 : index
    %c0_1 = arith.constant 0 : index
    %3 = vector.load %arg4[%c0, %c0_1] : memref<1x128xf32, #tpu.memory_space<vmem>>, vector<1x128xf32>
    %c0_2 = arith.constant 0 : index
    %c0_3 = arith.constant 0 : index
    %4 = vector.load %arg9[%c0_2, %c0_3] : memref<8x128xf32, #tpu.memory_space<vmem>>, vector<8x128xf32>
    %c0_i32_4 = arith.constant 0 : i32
    %5 = arith.index_cast %c0_i32_4 : i32 to index
    %c0_5 = arith.constant 0 : index
    %c0_6 = arith.constant 0 : index
    %6 = vector.load %arg2[%5, %c0_5, %c0_6] : memref<8x8x384xf32, #tpu.memory_space<vmem>>, vector<1x8x384xf32>
    %7 = vector.shape_cast %6 : vector<1x8x384xf32> to vector<8x384xf32>
    %c0_7 = arith.constant 0 : index
    %c0_8 = arith.constant 0 : index
    %8 = vector.load %arg3[%c0_7, %c0_8] : memref<128x384xf32, #tpu.memory_space<vmem>>, vector<128x384xf32>
    %cst = arith.constant dense<0.000000e+00> : vector<8x384xf32>
    %9 = tpu.matmul %4, %8, %cst {dimension_numbers = #tpu.dot_dimension_numbers<[1], [0], [0], [1], [0, 0, 1, 1], [], []>} : vector<8x128xf32>, vector<128x384xf32>, vector<8x384xf32> -> vector<8x384xf32>
    %10 = vector.extract_strided_slice %7 {offsets = [0, 0], sizes = [8, 128], strides = [1, 1]} : vector<8x384xf32> to vector<8x128xf32>
    %11 = vector.extract_strided_slice %9 {offsets = [0, 0], sizes = [8, 128], strides = [1, 1]} : vector<8x384xf32> to vector<8x128xf32>
    %12 = arith.addf %10, %11 : vector<8x128xf32>
    %13 = arith.negf %12 : vector<8x128xf32>
    %14 = math.exp %13 : vector<8x128xf32>
    %cst_9 = arith.constant 1.000000e+00 : f32
    %15 = vector.broadcast %cst_9 : f32 to vector<8x128xf32>
    %16 = arith.addf %15, %14 : vector<8x128xf32>
    %17 = arith.divf %15, %16 : vector<8x128xf32>
    %18 = vector.extract_strided_slice %7 {offsets = [0, 128], sizes = [8, 128], strides = [1, 1]} : vector<8x384xf32> to vector<8x128xf32>
    %19 = vector.extract_strided_slice %9 {offsets = [0, 128], sizes = [8, 128], strides = [1, 1]} : vector<8x384xf32> to vector<8x128xf32>
    %20 = arith.addf %18, %19 : vector<8x128xf32>
    %21 = arith.negf %20 : vector<8x128xf32>
    %22 = math.exp %21 : vector<8x128xf32>
    %cst_10 = arith.constant 1.000000e+00 : f32
    %23 = vector.broadcast %cst_10 : f32 to vector<8x128xf32>
    %24 = arith.addf %23, %22 : vector<8x128xf32>
    %25 = arith.divf %23, %24 : vector<8x128xf32>
    %26 = vector.extract_strided_slice %7 {offsets = [0, 256], sizes = [8, 128], strides = [1, 1]} : vector<8x384xf32> to vector<8x128xf32>
    %27 = vector.extract_strided_slice %9 {offsets = [0, 256], sizes = [8, 128], strides = [1, 1]} : vector<8x384xf32> to vector<8x128xf32>
    %28 = vector.broadcast %3 : vector<1x128xf32> to vector<8x128xf32>
    %29 = arith.addf %27, %28 : vector<8x128xf32>
    %30 = arith.mulf %17, %29 : vector<8x128xf32>
    %31 = arith.addf %26, %30 : vector<8x128xf32>
    %32 = math.tanh %31 : vector<8x128xf32>
    %cst_11 = arith.constant 1.000000e+00 : f32
    %33 = vector.broadcast %cst_11 : f32 to vector<8x128xf32>
    %34 = arith.subf %33, %25 : vector<8x128xf32>
    %35 = arith.mulf %34, %32 : vector<8x128xf32>
    %36 = arith.mulf %25, %4 : vector<8x128xf32>
    %37 = arith.addf %35, %36 : vector<8x128xf32>
    %38 = arith.index_cast %c0_i32_4 : i32 to index
    %c0_12 = arith.constant 0 : index
    %c0_13 = arith.constant 0 : index
    %39 = vector.load %arg7[%38, %c0_12, %c0_13] : memref<8x8x128xf32, #tpu.memory_space<vmem>>, vector<1x8x128xf32>
    %40 = vector.shape_cast %39 : vector<1x8x128xf32> to vector<8x128xf32>
    %41 = vector.shape_cast %37 : vector<8x128xf32> to vector<1x8x128xf32>
    tpu.vector_store %arg7[%38, %c0_12, %c0_13], %41 {strides = array<i32>} : memref<8x8x128xf32, #tpu.memory_space<vmem>>, vector<1x8x128xf32>,
    %c1_i32 = arith.constant 1 : i32
    %42 = arith.index_cast %c1_i32 : i32 to index
    %c0_14 = arith.constant 0 : index
    %c0_15 = arith.constant 0 : index
    %43 = vector.load %arg2[%42, %c0_14, %c0_15] : memref<8x8x384xf32, #tpu.memory_space<vmem>>, vector<1x8x384xf32>
    %44 = vector.shape_cast %43 : vector<1x8x384xf32> to vector<8x384xf32>
    %c0_16 = arith.constant 0 : index
    %c0_17 = arith.constant 0 : index
    %45 = vector.load %arg3[%c0_16, %c0_17] : memref<128x384xf32, #tpu.memory_space<vmem>>, vector<128x384xf32>
    %cst_18 = arith.constant dense<0.000000e+00> : vector<8x384xf32>
    %46 = tpu.matmul %37, %45, %cst_18 {dimension_numbers = #tpu.dot_dimension_numbers<[1], [0], [0], [1], [0, 0, 1, 1], [], []>} : vector<8x128xf32>, vector<128x384xf32>, vector<8x384xf32> -> vector<8x384xf32>
    %47 = vector.extract_strided_slice %44 {offsets = [0, 0], sizes = [8, 128], strides = [1, 1]} : vector<8x384xf32> to vector<8x128xf32>
    %48 = vector.extract_strided_slice %46 {offsets = [0, 0], sizes = [8, 128], strides = [1, 1]} : vector<8x384xf32> to vector<8x128xf32>
    %49 = arith.addf %47, %48 : vector<8x128xf32>
    %50 = arith.negf %49 : vector<8x128xf32>
    %51 = math.exp %50 : vector<8x128xf32>
    %cst_19 = arith.constant 1.000000e+00 : f32
    %52 = vector.broadcast %cst_19 : f32 to vector<8x128xf32>
    %53 = arith.addf %52, %51 : vector<8x128xf32>
    %54 = arith.divf %52, %53 : vector<8x128xf32>
    %55 = vector.extract_strided_slice %44 {offsets = [0, 128], sizes = [8, 128], strides = [1, 1]} : vector<8x384xf32> to vector<8x128xf32>
    %56 = vector.extract_strided_slice %46 {offsets = [0, 128], sizes = [8, 128], strides = [1, 1]} : vector<8x384xf32> to vector<8x128xf32>
    %57 = arith.addf %55, %56 : vector<8x128xf32>
    %58 = arith.negf %57 : vector<8x128xf32>
    %59 = math.exp %58 : vector<8x128xf32>
    %cst_20 = arith.constant 1.000000e+00 : f32
    %60 = vector.broadcast %cst_20 : f32 to vector<8x128xf32>
    %61 = arith.addf %60, %59 : vector<8x128xf32>
    %62 = arith.divf %60, %61 : vector<8x128xf32>
    %63 = vector.extract_strided_slice %44 {offsets = [0, 256], sizes = [8, 128], strides = [1, 1]} : vector<8x384xf32> to vector<8x128xf32>
    %64 = vector.extract_strided_slice %46 {offsets = [0, 256], sizes = [8, 128], strides = [1, 1]} : vector<8x384xf32> to vector<8x128xf32>
    %65 = vector.broadcast %3 : vector<1x128xf32> to vector<8x128xf32>
    %66 = arith.addf %64, %65 : vector<8x128xf32>
    %67 = arith.mulf %54, %66 : vector<8x128xf32>
    %68 = arith.addf %63, %67 : vector<8x128xf32>
    %69 = math.tanh %68 : vector<8x128xf32>
    %cst_21 = arith.constant 1.000000e+00 : f32
    %70 = vector.broadcast %cst_21 : f32 to vector<8x128xf32>
    %71 = arith.subf %70, %62 : vector<8x128xf32>
    %72 = arith.mulf %71, %69 : vector<8x128xf32>
    %73 = arith.mulf %62, %37 : vector<8x128xf32>
    %74 = arith.addf %72, %73 : vector<8x128xf32>
    %75 = arith.index_cast %c1_i32 : i32 to index
    %c0_22 = arith.constant 0 : index
    %c0_23 = arith.constant 0 : index
    %76 = vector.load %arg7[%75, %c0_22, %c0_23] : memref<8x8x128xf32, #tpu.memory_space<vmem>>, vector<1x8x128xf32>
    %77 = vector.shape_cast %76 : vector<1x8x128xf32> to vector<8x128xf32>
    %78 = vector.shape_cast %74 : vector<8x128xf32> to vector<1x8x128xf32>
    tpu.vector_store %arg7[%75, %c0_22, %c0_23], %78 {strides = array<i32>} : memref<8x8x128xf32, #tpu.memory_space<vmem>>, vector<1x8x128xf32>,
    %c2_i32 = arith.constant 2 : i32
    %79 = arith.index_cast %c2_i32 : i32 to index
    %c0_24 = arith.constant 0 : index
    %c0_25 = arith.constant 0 : index
    %80 = vector.load %arg2[%79, %c0_24, %c0_25] : memref<8x8x384xf32, #tpu.memory_space<vmem>>, vector<1x8x384xf32>
    %81 = vector.shape_cast %80 : vector<1x8x384xf32> to vector<8x384xf32>
    %c0_26 = arith.constant 0 : index
    %c0_27 = arith.constant 0 : index
    %82 = vector.load %arg3[%c0_26, %c0_27] : memref<128x384xf32, #tpu.memory_space<vmem>>, vector<128x384xf32>
    %cst_28 = arith.constant dense<0.000000e+00> : vector<8x384xf32>
    %83 = tpu.matmul %74, %82, %cst_28 {dimension_numbers = #tpu.dot_dimension_numbers<[1], [0], [0], [1], [0, 0, 1, 1], [], []>} : vector<8x128xf32>, vector<128x384xf32>, vector<8x384xf32> -> vector<8x384xf32>
    %84 = vector.extract_strided_slice %81 {offsets = [0, 0], sizes = [8, 128], strides = [1, 1]} : vector<8x384xf32> to vector<8x128xf32>
    %85 = vector.extract_strided_slice %83 {offsets = [0, 0], sizes = [8, 128], strides = [1, 1]} : vector<8x384xf32> to vector<8x128xf32>
    %86 = arith.addf %84, %85 : vector<8x128xf32>
    %87 = arith.negf %86 : vector<8x128xf32>
    %88 = math.exp %87 : vector<8x128xf32>
    %cst_29 = arith.constant 1.000000e+00 : f32
    %89 = vector.broadcast %cst_29 : f32 to vector<8x128xf32>
    %90 = arith.addf %89, %88 : vector<8x128xf32>
    %91 = arith.divf %89, %90 : vector<8x128xf32>
    %92 = vector.extract_strided_slice %81 {offsets = [0, 128], sizes = [8, 128], strides = [1, 1]} : vector<8x384xf32> to vector<8x128xf32>
    %93 = vector.extract_strided_slice %83 {offsets = [0, 128], sizes = [8, 128], strides = [1, 1]} : vector<8x384xf32> to vector<8x128xf32>
    %94 = arith.addf %92, %93 : vector<8x128xf32>
    %95 = arith.negf %94 : vector<8x128xf32>
    %96 = math.exp %95 : vector<8x128xf32>
    %cst_30 = arith.constant 1.000000e+00 : f32
    %97 = vector.broadcast %cst_30 : f32 to vector<8x128xf32>
    %98 = arith.addf %97, %96 : vector<8x128xf32>
    %99 = arith.divf %97, %98 : vector<8x128xf32>
    %100 = vector.extract_strided_slice %81 {offsets = [0, 256], sizes = [8, 128], strides = [1, 1]} : vector<8x384xf32> to vector<8x128xf32>
    %101 = vector.extract_strided_slice %83 {offsets = [0, 256], sizes = [8, 128], strides = [1, 1]} : vector<8x384xf32> to vector<8x128xf32>
    %102 = vector.broadcast %3 : vector<1x128xf32> to vector<8x128xf32>
    %103 = arith.addf %101, %102 : vector<8x128xf32>
    %104 = arith.mulf %91, %103 : vector<8x128xf32>
    %105 = arith.addf %100, %104 : vector<8x128xf32>
    %106 = math.tanh %105 : vector<8x128xf32>
    %cst_31 = arith.constant 1.000000e+00 : f32
    %107 = vector.broadcast %cst_31 : f32 to vector<8x128xf32>
    %108 = arith.subf %107, %99 : vector<8x128xf32>
    %109 = arith.mulf %108, %106 : vector<8x128xf32>
    %110 = arith.mulf %99, %74 : vector<8x128xf32>
    %111 = arith.addf %109, %110 : vector<8x128xf32>
    %112 = arith.index_cast %c2_i32 : i32 to index
    %c0_32 = arith.constant 0 : index
    %c0_33 = arith.constant 0 : index
    %113 = vector.load %arg7[%112, %c0_32, %c0_33] : memref<8x8x128xf32, #tpu.memory_space<vmem>>, vector<1x8x128xf32>
    %114 = vector.shape_cast %113 : vector<1x8x128xf32> to vector<8x128xf32>
    %115 = vector.shape_cast %111 : vector<8x128xf32> to vector<1x8x128xf32>
    tpu.vector_store %arg7[%112, %c0_32, %c0_33], %115 {strides = array<i32>} : memref<8x8x128xf32, #tpu.memory_space<vmem>>, vector<1x8x128xf32>,
    %c3_i32 = arith.constant 3 : i32
    %116 = arith.index_cast %c3_i32 : i32 to index
    %c0_34 = arith.constant 0 : index
    %c0_35 = arith.constant 0 : index
    %117 = vector.load %arg2[%116, %c0_34, %c0_35] : memref<8x8x384xf32, #tpu.memory_space<vmem>>, vector<1x8x384xf32>
    %118 = vector.shape_cast %117 : vector<1x8x384xf32> to vector<8x384xf32>
    %c0_36 = arith.constant 0 : index
    %c0_37 = arith.constant 0 : index
    %119 = vector.load %arg3[%c0_36, %c0_37] : memref<128x384xf32, #tpu.memory_space<vmem>>, vector<128x384xf32>
    %cst_38 = arith.constant dense<0.000000e+00> : vector<8x384xf32>
    %120 = tpu.matmul %111, %119, %cst_38 {dimension_numbers = #tpu.dot_dimension_numbers<[1], [0], [0], [1], [0, 0, 1, 1], [], []>} : vector<8x128xf32>, vector<128x384xf32>, vector<8x384xf32> -> vector<8x384xf32>
    %121 = vector.extract_strided_slice %118 {offsets = [0, 0], sizes = [8, 128], strides = [1, 1]} : vector<8x384xf32> to vector<8x128xf32>
    %122 = vector.extract_strided_slice %120 {offsets = [0, 0], sizes = [8, 128], strides = [1, 1]} : vector<8x384xf32> to vector<8x128xf32>
    %123 = arith.addf %121, %122 : vector<8x128xf32>
    %124 = arith.negf %123 : vector<8x128xf32>
    %125 = math.exp %124 : vector<8x128xf32>
    %cst_39 = arith.constant 1.000000e+00 : f32
    %126 = vector.broadcast %cst_39 : f32 to vector<8x128xf32>
    %127 = arith.addf %126, %125 : vector<8x128xf32>
    %128 = arith.divf %126, %127 : vector<8x128xf32>
    %129 = vector.extract_strided_slice %118 {offsets = [0, 128], sizes = [8, 128], strides = [1, 1]} : vector<8x384xf32> to vector<8x128xf32>
    %130 = vector.extract_strided_slice %120 {offsets = [0, 128], sizes = [8, 128], strides = [1, 1]} : vector<8x384xf32> to vector<8x128xf32>
    %131 = arith.addf %129, %130 : vector<8x128xf32>
    %132 = arith.negf %131 : vector<8x128xf32>
    %133 = math.exp %132 : vector<8x128xf32>
    %cst_40 = arith.constant 1.000000e+00 : f32
    %134 = vector.broadcast %cst_40 : f32 to vector<8x128xf32>
    %135 = arith.addf %134, %133 : vector<8x128xf32>
    %136 = arith.divf %134, %135 : vector<8x128xf32>
    %137 = vector.extract_strided_slice %118 {offsets = [0, 256], sizes = [8, 128], strides = [1, 1]} : vector<8x384xf32> to vector<8x128xf32>
    %138 = vector.extract_strided_slice %120 {offsets = [0, 256], sizes = [8, 128], strides = [1, 1]} : vector<8x384xf32> to vector<8x128xf32>
    %139 = vector.broadcast %3 : vector<1x128xf32> to vector<8x128xf32>
    %140 = arith.addf %138, %139 : vector<8x128xf32>
    %141 = arith.mulf %128, %140 : vector<8x128xf32>
    %142 = arith.addf %137, %141 : vector<8x128xf32>
    %143 = math.tanh %142 : vector<8x128xf32>
    %cst_41 = arith.constant 1.000000e+00 : f32
    %144 = vector.broadcast %cst_41 : f32 to vector<8x128xf32>
    %145 = arith.subf %144, %136 : vector<8x128xf32>
    %146 = arith.mulf %145, %143 : vector<8x128xf32>
    %147 = arith.mulf %136, %111 : vector<8x128xf32>
    %148 = arith.addf %146, %147 : vector<8x128xf32>
    %149 = arith.index_cast %c3_i32 : i32 to index
    %c0_42 = arith.constant 0 : index
    %c0_43 = arith.constant 0 : index
    %150 = vector.load %arg7[%149, %c0_42, %c0_43] : memref<8x8x128xf32, #tpu.memory_space<vmem>>, vector<1x8x128xf32>
    %151 = vector.shape_cast %150 : vector<1x8x128xf32> to vector<8x128xf32>
    %152 = vector.shape_cast %148 : vector<8x128xf32> to vector<1x8x128xf32>
    tpu.vector_store %arg7[%149, %c0_42, %c0_43], %152 {strides = array<i32>} : memref<8x8x128xf32, #tpu.memory_space<vmem>>, vector<1x8x128xf32>,
    %c4_i32 = arith.constant 4 : i32
    %153 = arith.index_cast %c4_i32 : i32 to index
    %c0_44 = arith.constant 0 : index
    %c0_45 = arith.constant 0 : index
    %154 = vector.load %arg2[%153, %c0_44, %c0_45] : memref<8x8x384xf32, #tpu.memory_space<vmem>>, vector<1x8x384xf32>
    %155 = vector.shape_cast %154 : vector<1x8x384xf32> to vector<8x384xf32>
    %c0_46 = arith.constant 0 : index
    %c0_47 = arith.constant 0 : index
    %156 = vector.load %arg3[%c0_46, %c0_47] : memref<128x384xf32, #tpu.memory_space<vmem>>, vector<128x384xf32>
    %cst_48 = arith.constant dense<0.000000e+00> : vector<8x384xf32>
    %157 = tpu.matmul %148, %156, %cst_48 {dimension_numbers = #tpu.dot_dimension_numbers<[1], [0], [0], [1], [0, 0, 1, 1], [], []>} : vector<8x128xf32>, vector<128x384xf32>, vector<8x384xf32> -> vector<8x384xf32>
    %158 = vector.extract_strided_slice %155 {offsets = [0, 0], sizes = [8, 128], strides = [1, 1]} : vector<8x384xf32> to vector<8x128xf32>
    %159 = vector.extract_strided_slice %157 {offsets = [0, 0], sizes = [8, 128], strides = [1, 1]} : vector<8x384xf32> to vector<8x128xf32>
    %160 = arith.addf %158, %159 : vector<8x128xf32>
    %161 = arith.negf %160 : vector<8x128xf32>
    %162 = math.exp %161 : vector<8x128xf32>
    %cst_49 = arith.constant 1.000000e+00 : f32
    %163 = vector.broadcast %cst_49 : f32 to vector<8x128xf32>
    %164 = arith.addf %163, %162 : vector<8x128xf32>
    %165 = arith.divf %163, %164 : vector<8x128xf32>
    %166 = vector.extract_strided_slice %155 {offsets = [0, 128], sizes = [8, 128], strides = [1, 1]} : vector<8x384xf32> to vector<8x128xf32>
    %167 = vector.extract_strided_slice %157 {offsets = [0, 128], sizes = [8, 128], strides = [1, 1]} : vector<8x384xf32> to vector<8x128xf32>
    %168 = arith.addf %166, %167 : vector<8x128xf32>
    %169 = arith.negf %168 : vector<8x128xf32>
    %170 = math.exp %169 : vector<8x128xf32>
    %cst_50 = arith.constant 1.000000e+00 : f32
    %171 = vector.broadcast %cst_50 : f32 to vector<8x128xf32>
    %172 = arith.addf %171, %170 : vector<8x128xf32>
    %173 = arith.divf %171, %172 : vector<8x128xf32>
    %174 = vector.extract_strided_slice %155 {offsets = [0, 256], sizes = [8, 128], strides = [1, 1]} : vector<8x384xf32> to vector<8x128xf32>
    %175 = vector.extract_strided_slice %157 {offsets = [0, 256], sizes = [8, 128], strides = [1, 1]} : vector<8x384xf32> to vector<8x128xf32>
    %176 = vector.broadcast %3 : vector<1x128xf32> to vector<8x128xf32>
    %177 = arith.addf %175, %176 : vector<8x128xf32>
    %178 = arith.mulf %165, %177 : vector<8x128xf32>
    %179 = arith.addf %174, %178 : vector<8x128xf32>
    %180 = math.tanh %179 : vector<8x128xf32>
    %cst_51 = arith.constant 1.000000e+00 : f32
    %181 = vector.broadcast %cst_51 : f32 to vector<8x128xf32>
    %182 = arith.subf %181, %173 : vector<8x128xf32>
    %183 = arith.mulf %182, %180 : vector<8x128xf32>
    %184 = arith.mulf %173, %148 : vector<8x128xf32>
    %185 = arith.addf %183, %184 : vector<8x128xf32>
    %186 = arith.index_cast %c4_i32 : i32 to index
    %c0_52 = arith.constant 0 : index
    %c0_53 = arith.constant 0 : index
    %187 = vector.load %arg7[%186, %c0_52, %c0_53] : memref<8x8x128xf32, #tpu.memory_space<vmem>>, vector<1x8x128xf32>
    %188 = vector.shape_cast %187 : vector<1x8x128xf32> to vector<8x128xf32>
    %189 = vector.shape_cast %185 : vector<8x128xf32> to vector<1x8x128xf32>
    tpu.vector_store %arg7[%186, %c0_52, %c0_53], %189 {strides = array<i32>} : memref<8x8x128xf32, #tpu.memory_space<vmem>>, vector<1x8x128xf32>,
    %c5_i32 = arith.constant 5 : i32
    %190 = arith.index_cast %c5_i32 : i32 to index
    %c0_54 = arith.constant 0 : index
    %c0_55 = arith.constant 0 : index
    %191 = vector.load %arg2[%190, %c0_54, %c0_55] : memref<8x8x384xf32, #tpu.memory_space<vmem>>, vector<1x8x384xf32>
    %192 = vector.shape_cast %191 : vector<1x8x384xf32> to vector<8x384xf32>
    %c0_56 = arith.constant 0 : index
    %c0_57 = arith.constant 0 : index
    %193 = vector.load %arg3[%c0_56, %c0_57] : memref<128x384xf32, #tpu.memory_space<vmem>>, vector<128x384xf32>
    %cst_58 = arith.constant dense<0.000000e+00> : vector<8x384xf32>
    %194 = tpu.matmul %185, %193, %cst_58 {dimension_numbers = #tpu.dot_dimension_numbers<[1], [0], [0], [1], [0, 0, 1, 1], [], []>} : vector<8x128xf32>, vector<128x384xf32>, vector<8x384xf32> -> vector<8x384xf32>
    %195 = vector.extract_strided_slice %192 {offsets = [0, 0], sizes = [8, 128], strides = [1, 1]} : vector<8x384xf32> to vector<8x128xf32>
    %196 = vector.extract_strided_slice %194 {offsets = [0, 0], sizes = [8, 128], strides = [1, 1]} : vector<8x384xf32> to vector<8x128xf32>
    %197 = arith.addf %195, %196 : vector<8x128xf32>
    %198 = arith.negf %197 : vector<8x128xf32>
    %199 = math.exp %198 : vector<8x128xf32>
    %cst_59 = arith.constant 1.000000e+00 : f32
    %200 = vector.broadcast %cst_59 : f32 to vector<8x128xf32>
    %201 = arith.addf %200, %199 : vector<8x128xf32>
    %202 = arith.divf %200, %201 : vector<8x128xf32>
    %203 = vector.extract_strided_slice %192 {offsets = [0, 128], sizes = [8, 128], strides = [1, 1]} : vector<8x384xf32> to vector<8x128xf32>
    %204 = vector.extract_strided_slice %194 {offsets = [0, 128], sizes = [8, 128], strides = [1, 1]} : vector<8x384xf32> to vector<8x128xf32>
    %205 = arith.addf %203, %204 : vector<8x128xf32>
    %206 = arith.negf %205 : vector<8x128xf32>
    %207 = math.exp %206 : vector<8x128xf32>
    %cst_60 = arith.constant 1.000000e+00 : f32
    %208 = vector.broadcast %cst_60 : f32 to vector<8x128xf32>
    %209 = arith.addf %208, %207 : vector<8x128xf32>
    %210 = arith.divf %208, %209 : vector<8x128xf32>
    %211 = vector.extract_strided_slice %192 {offsets = [0, 256], sizes = [8, 128], strides = [1, 1]} : vector<8x384xf32> to vector<8x128xf32>
    %212 = vector.extract_strided_slice %194 {offsets = [0, 256], sizes = [8, 128], strides = [1, 1]} : vector<8x384xf32> to vector<8x128xf32>
    %213 = vector.broadcast %3 : vector<1x128xf32> to vector<8x128xf32>
    %214 = arith.addf %212, %213 : vector<8x128xf32>
    %215 = arith.mulf %202, %214 : vector<8x128xf32>
    %216 = arith.addf %211, %215 : vector<8x128xf32>
    %217 = math.tanh %216 : vector<8x128xf32>
    %cst_61 = arith.constant 1.000000e+00 : f32
    %218 = vector.broadcast %cst_61 : f32 to vector<8x128xf32>
    %219 = arith.subf %218, %210 : vector<8x128xf32>
    %220 = arith.mulf %219, %217 : vector<8x128xf32>
    %221 = arith.mulf %210, %185 : vector<8x128xf32>
    %222 = arith.addf %220, %221 : vector<8x128xf32>
    %223 = arith.index_cast %c5_i32 : i32 to index
    %c0_62 = arith.constant 0 : index
    %c0_63 = arith.constant 0 : index
    %224 = vector.load %arg7[%223, %c0_62, %c0_63] : memref<8x8x128xf32, #tpu.memory_space<vmem>>, vector<1x8x128xf32>
    %225 = vector.shape_cast %224 : vector<1x8x128xf32> to vector<8x128xf32>
    %226 = vector.shape_cast %222 : vector<8x128xf32> to vector<1x8x128xf32>
    tpu.vector_store %arg7[%223, %c0_62, %c0_63], %226 {strides = array<i32>} : memref<8x8x128xf32, #tpu.memory_space<vmem>>, vector<1x8x128xf32>,
    %c6_i32 = arith.constant 6 : i32
    %227 = arith.index_cast %c6_i32 : i32 to index
    %c0_64 = arith.constant 0 : index
    %c0_65 = arith.constant 0 : index
    %228 = vector.load %arg2[%227, %c0_64, %c0_65] : memref<8x8x384xf32, #tpu.memory_space<vmem>>, vector<1x8x384xf32>
    %229 = vector.shape_cast %228 : vector<1x8x384xf32> to vector<8x384xf32>
    %c0_66 = arith.constant 0 : index
    %c0_67 = arith.constant 0 : index
    %230 = vector.load %arg3[%c0_66, %c0_67] : memref<128x384xf32, #tpu.memory_space<vmem>>, vector<128x384xf32>
    %cst_68 = arith.constant dense<0.000000e+00> : vector<8x384xf32>
    %231 = tpu.matmul %222, %230, %cst_68 {dimension_numbers = #tpu.dot_dimension_numbers<[1], [0], [0], [1], [0, 0, 1, 1], [], []>} : vector<8x128xf32>, vector<128x384xf32>, vector<8x384xf32> -> vector<8x384xf32>
    %232 = vector.extract_strided_slice %229 {offsets = [0, 0], sizes = [8, 128], strides = [1, 1]} : vector<8x384xf32> to vector<8x128xf32>
    %233 = vector.extract_strided_slice %231 {offsets = [0, 0], sizes = [8, 128], strides = [1, 1]} : vector<8x384xf32> to vector<8x128xf32>
    %234 = arith.addf %232, %233 : vector<8x128xf32>
    %235 = arith.negf %234 : vector<8x128xf32>
    %236 = math.exp %235 : vector<8x128xf32>
    %cst_69 = arith.constant 1.000000e+00 : f32
    %237 = vector.broadcast %cst_69 : f32 to vector<8x128xf32>
    %238 = arith.addf %237, %236 : vector<8x128xf32>
    %239 = arith.divf %237, %238 : vector<8x128xf32>
    %240 = vector.extract_strided_slice %229 {offsets = [0, 128], sizes = [8, 128], strides = [1, 1]} : vector<8x384xf32> to vector<8x128xf32>
    %241 = vector.extract_strided_slice %231 {offsets = [0, 128], sizes = [8, 128], strides = [1, 1]} : vector<8x384xf32> to vector<8x128xf32>
    %242 = arith.addf %240, %241 : vector<8x128xf32>
    %243 = arith.negf %242 : vector<8x128xf32>
    %244 = math.exp %243 : vector<8x128xf32>
    %cst_70 = arith.constant 1.000000e+00 : f32
    %245 = vector.broadcast %cst_70 : f32 to vector<8x128xf32>
    %246 = arith.addf %245, %244 : vector<8x128xf32>
    %247 = arith.divf %245, %246 : vector<8x128xf32>
    %248 = vector.extract_strided_slice %229 {offsets = [0, 256], sizes = [8, 128], strides = [1, 1]} : vector<8x384xf32> to vector<8x128xf32>
    %249 = vector.extract_strided_slice %231 {offsets = [0, 256], sizes = [8, 128], strides = [1, 1]} : vector<8x384xf32> to vector<8x128xf32>
    %250 = vector.broadcast %3 : vector<1x128xf32> to vector<8x128xf32>
    %251 = arith.addf %249, %250 : vector<8x128xf32>
    %252 = arith.mulf %239, %251 : vector<8x128xf32>
    %253 = arith.addf %248, %252 : vector<8x128xf32>
    %254 = math.tanh %253 : vector<8x128xf32>
    %cst_71 = arith.constant 1.000000e+00 : f32
    %255 = vector.broadcast %cst_71 : f32 to vector<8x128xf32>
    %256 = arith.subf %255, %247 : vector<8x128xf32>
    %257 = arith.mulf %256, %254 : vector<8x128xf32>
    %258 = arith.mulf %247, %222 : vector<8x128xf32>
    %259 = arith.addf %257, %258 : vector<8x128xf32>
    %260 = arith.index_cast %c6_i32 : i32 to index
    %c0_72 = arith.constant 0 : index
    %c0_73 = arith.constant 0 : index
    %261 = vector.load %arg7[%260, %c0_72, %c0_73] : memref<8x8x128xf32, #tpu.memory_space<vmem>>, vector<1x8x128xf32>
    %262 = vector.shape_cast %261 : vector<1x8x128xf32> to vector<8x128xf32>
    %263 = vector.shape_cast %259 : vector<8x128xf32> to vector<1x8x128xf32>
    tpu.vector_store %arg7[%260, %c0_72, %c0_73], %263 {strides = array<i32>} : memref<8x8x128xf32, #tpu.memory_space<vmem>>, vector<1x8x128xf32>,
    %c7_i32 = arith.constant 7 : i32
    %264 = arith.index_cast %c7_i32 : i32 to index
    %c0_74 = arith.constant 0 : index
    %c0_75 = arith.constant 0 : index
    %265 = vector.load %arg2[%264, %c0_74, %c0_75] : memref<8x8x384xf32, #tpu.memory_space<vmem>>, vector<1x8x384xf32>
    %266 = vector.shape_cast %265 : vector<1x8x384xf32> to vector<8x384xf32>
    %c0_76 = arith.constant 0 : index
    %c0_77 = arith.constant 0 : index
    %267 = vector.load %arg3[%c0_76, %c0_77] : memref<128x384xf32, #tpu.memory_space<vmem>>, vector<128x384xf32>
    %cst_78 = arith.constant dense<0.000000e+00> : vector<8x384xf32>
    %268 = tpu.matmul %259, %267, %cst_78 {dimension_numbers = #tpu.dot_dimension_numbers<[1], [0], [0], [1], [0, 0, 1, 1], [], []>} : vector<8x128xf32>, vector<128x384xf32>, vector<8x384xf32> -> vector<8x384xf32>
    %269 = vector.extract_strided_slice %266 {offsets = [0, 0], sizes = [8, 128], strides = [1, 1]} : vector<8x384xf32> to vector<8x128xf32>
    %270 = vector.extract_strided_slice %268 {offsets = [0, 0], sizes = [8, 128], strides = [1, 1]} : vector<8x384xf32> to vector<8x128xf32>
    %271 = arith.addf %269, %270 : vector<8x128xf32>
    %272 = arith.negf %271 : vector<8x128xf32>
    %273 = math.exp %272 : vector<8x128xf32>
    %cst_79 = arith.constant 1.000000e+00 : f32
    %274 = vector.broadcast %cst_79 : f32 to vector<8x128xf32>
    %275 = arith.addf %274, %273 : vector<8x128xf32>
    %276 = arith.divf %274, %275 : vector<8x128xf32>
    %277 = vector.extract_strided_slice %266 {offsets = [0, 128], sizes = [8, 128], strides = [1, 1]} : vector<8x384xf32> to vector<8x128xf32>
    %278 = vector.extract_strided_slice %268 {offsets = [0, 128], sizes = [8, 128], strides = [1, 1]} : vector<8x384xf32> to vector<8x128xf32>
    %279 = arith.addf %277, %278 : vector<8x128xf32>
    %280 = arith.negf %279 : vector<8x128xf32>
    %281 = math.exp %280 : vector<8x128xf32>
    %cst_80 = arith.constant 1.000000e+00 : f32
    %282 = vector.broadcast %cst_80 : f32 to vector<8x128xf32>
    %283 = arith.addf %282, %281 : vector<8x128xf32>
    %284 = arith.divf %282, %283 : vector<8x128xf32>
    %285 = vector.extract_strided_slice %266 {offsets = [0, 256], sizes = [8, 128], strides = [1, 1]} : vector<8x384xf32> to vector<8x128xf32>
    %286 = vector.extract_strided_slice %268 {offsets = [0, 256], sizes = [8, 128], strides = [1, 1]} : vector<8x384xf32> to vector<8x128xf32>
    %287 = vector.broadcast %3 : vector<1x128xf32> to vector<8x128xf32>
    %288 = arith.addf %286, %287 : vector<8x128xf32>
    %289 = arith.mulf %276, %288 : vector<8x128xf32>
    %290 = arith.addf %285, %289 : vector<8x128xf32>
    %291 = math.tanh %290 : vector<8x128xf32>
    %cst_81 = arith.constant 1.000000e+00 : f32
    %292 = vector.broadcast %cst_81 : f32 to vector<8x128xf32>
    %293 = arith.subf %292, %284 : vector<8x128xf32>
    %294 = arith.mulf %293, %291 : vector<8x128xf32>
    %295 = arith.mulf %284, %259 : vector<8x128xf32>
    %296 = arith.addf %294, %295 : vector<8x128xf32>
    %297 = arith.index_cast %c7_i32 : i32 to index
    %c0_82 = arith.constant 0 : index
    %c0_83 = arith.constant 0 : index
    %298 = vector.load %arg7[%297, %c0_82, %c0_83] : memref<8x8x128xf32, #tpu.memory_space<vmem>>, vector<1x8x128xf32>
    %299 = vector.shape_cast %298 : vector<1x8x128xf32> to vector<8x128xf32>
    %300 = vector.shape_cast %296 : vector<8x128xf32> to vector<1x8x128xf32>
    tpu.vector_store %arg7[%297, %c0_82, %c0_83], %300 {strides = array<i32>} : memref<8x8x128xf32, #tpu.memory_space<vmem>>, vector<1x8x128xf32>,
    %c8_i32 = arith.constant 8 : i32
    %c0_84 = arith.constant 0 : index
    %c0_85 = arith.constant 0 : index
    %301 = vector.load %arg9[%c0_84, %c0_85] : memref<8x128xf32, #tpu.memory_space<vmem>>, vector<8x128xf32>
    tpu.vector_store %arg9[%c0_84, %c0_85], %296 {strides = array<i32>} : memref<8x128xf32, #tpu.memory_space<vmem>>, vector<8x128xf32>,
    %c0_86 = arith.constant 0 : index
    %c0_87 = arith.constant 0 : index
    %c0_88 = arith.constant 0 : index
    %302 = vector.load %arg7[%c0_86, %c0_87, %c0_88] : memref<8x8x128xf32, #tpu.memory_space<vmem>>, vector<8x8x128xf32>
    %303 = vector.shape_cast %302 : vector<8x8x128xf32> to vector<64x128xf32>
    %c0_89 = arith.constant 0 : index
    %c0_90 = arith.constant 0 : index
    %304 = vector.load %arg5[%c0_89, %c0_90] : memref<128x128xf32, #tpu.memory_space<vmem>>, vector<128x128xf32>
    %cst_91 = arith.constant dense<0.000000e+00> : vector<64x128xf32>
    %305 = tpu.matmul %303, %304, %cst_91 {dimension_numbers = #tpu.dot_dimension_numbers<[1], [0], [0], [1], [0, 0, 1, 1], [], []>} : vector<64x128xf32>, vector<128x128xf32>, vector<64x128xf32> -> vector<64x128xf32>
    %c0_92 = arith.constant 0 : index
    %c0_93 = arith.constant 0 : index
    %306 = vector.load %arg6[%c0_92, %c0_93] : memref<1x128xf32, #tpu.memory_space<vmem>>, vector<1x128xf32>
    %307 = vector.broadcast %306 : vector<1x128xf32> to vector<64x128xf32>
    %308 = arith.addf %305, %307 : vector<64x128xf32>
    %309 = vector.shape_cast %308 : vector<64x128xf32> to vector<8x8x128xf32>
    %c0_94 = arith.constant 0 : index
    %c0_95 = arith.constant 0 : index
    %c0_96 = arith.constant 0 : index
    %310 = vector.load %arg8[%c0_94, %c0_95, %c0_96] : memref<8x8x128xf32, #tpu.memory_space<vmem>>, vector<8x8x128xf32>
    tpu.vector_store %arg8[%c0_94, %c0_95, %c0_96], %309 {strides = array<i32>} : memref<8x8x128xf32, #tpu.memory_space<vmem>>, vector<8x8x128xf32>,
    return
  }
  func.func @transform_0(%arg0: i32, %arg1: i32) -> (i32, i32, i32) {
    %c0_i32 = arith.constant 0 : i32
    %c0_i32_0 = arith.constant 0 : i32
    return %arg1, %arg0, %c0_i32 : i32, i32, i32
  }
  func.func @transform_1(%arg0: i32, %arg1: i32) -> (i32, i32) {
    %c0_i32 = arith.constant 0 : i32
    %c0_i32_0 = arith.constant 0 : i32
    %c0_i32_1 = arith.constant 0 : i32
    return %c0_i32, %c0_i32_0 : i32, i32
  }
  func.func @transform_2(%arg0: i32, %arg1: i32) -> (i32, i32) {
    %c0_i32 = arith.constant 0 : i32
    %c0_i32_0 = arith.constant 0 : i32
    %c0_i32_1 = arith.constant 0 : i32
    return %c0_i32, %c0_i32_0 : i32, i32
  }
  func.func @transform_3(%arg0: i32, %arg1: i32) -> (i32, i32) {
    %c0_i32 = arith.constant 0 : i32
    %c0_i32_0 = arith.constant 0 : i32
    %c0_i32_1 = arith.constant 0 : i32
    return %c0_i32, %c0_i32_0 : i32, i32
  }
  func.func @transform_4(%arg0: i32, %arg1: i32) -> (i32, i32) {
    %c0_i32 = arith.constant 0 : i32
    %c0_i32_0 = arith.constant 0 : i32
    %c0_i32_1 = arith.constant 0 : i32
    return %c0_i32, %c0_i32_0 : i32, i32
  }
  func.func @transform_5(%arg0: i32, %arg1: i32) -> (i32, i32, i32) {
    %c0_i32 = arith.constant 0 : i32
    %c0_i32_0 = arith.constant 0 : i32
    return %arg1, %arg0, %c0_i32 : i32, i32, i32
  }
  func.func @transform_6(%arg0: i32, %arg1: i32) -> (i32, i32, i32) {
    %c0_i32 = arith.constant 0 : i32
    %c0_i32_0 = arith.constant 0 : i32
    return %arg1, %arg0, %c0_i32 : i32, i32, i32
  }
}

module attributes {stable_mosaic.version = 11 : i64} {
  func.func @attn_head_kernel(%arg0: i32, %arg1: memref<8x8x128xf32, #tpu.memory_space<vmem>>, %arg2: memref<128x128xf32, #tpu.memory_space<vmem>>, %arg3: memref<2x128x128xf32, #tpu.memory_space<vmem>>, %arg4: memref<1x128xf32, #tpu.memory_space<vmem>>, %arg5: memref<8x128xf32, #tpu.memory_space<vmem>>) attributes {dimension_semantics = [#tpu.dimension_semantics<parallel>], iteration_bounds = array<i64: 1>, scalar_prefetch = 0 : i64, scratch_operands = 0 : i64, tpu.core_type = #tpu.core_type<tc>, window_params = [{transform_indices = @transform_0, window_bounds = array<i64: 8, 8, 128>}, {pipeline_mode = #tpu.pipeline_mode<synchronous>, transform_indices = @transform_1, window_bounds = array<i64: 128, 128>}, {pipeline_mode = #tpu.pipeline_mode<synchronous>, transform_indices = @transform_2, window_bounds = array<i64: 2, 128, 128>}, {pipeline_mode = #tpu.pipeline_mode<synchronous>, transform_indices = @transform_3, window_bounds = array<i64: 1, 128>}, {transform_indices = @transform_4, window_bounds = array<i64: 8, 128>}]} {
    %c0 = arith.constant 0 : index
    %c0_0 = arith.constant 0 : index
    %c0_1 = arith.constant 0 : index
    %0 = vector.load %arg1[%c0, %c0_0, %c0_1] : memref<8x8x128xf32, #tpu.memory_space<vmem>>, vector<8x8x128xf32>
    %1 = vector.extract_strided_slice %0 {offsets = [7, 0, 0], sizes = [1, 8, 128], strides = [1, 1, 1]} : vector<8x8x128xf32> to vector<1x8x128xf32>
    %2 = vector.shape_cast %1 : vector<1x8x128xf32> to vector<8x128xf32>
    %c0_2 = arith.constant 0 : index
    %c0_3 = arith.constant 0 : index
    %3 = vector.load %arg2[%c0_2, %c0_3] : memref<128x128xf32, #tpu.memory_space<vmem>>, vector<128x128xf32>
    %cst = arith.constant dense<0.000000e+00> : vector<8x128xf32>
    %4 = tpu.matmul %2, %3, %cst {dimension_numbers = #tpu.dot_dimension_numbers<[1], [0], [0], [1], [0, 0, 1, 1], [], []>} : vector<8x128xf32>, vector<128x128xf32>, vector<8x128xf32> -> vector<8x128xf32>
    %5 = vector.shape_cast %4 : vector<8x128xf32> to vector<1x8x128xf32>
    %6 = vector.broadcast %5 : vector<1x8x128xf32> to vector<8x8x128xf32>
    %7 = arith.mulf %0, %6 : vector<8x8x128xf32>
    %cst_4 = arith.constant dense<0.000000e+00> : vector<8x8xf32>
    %8 = vector.multi_reduction <add>, %7, %cst_4 [2] : vector<8x8x128xf32> to vector<8x8xf32>
    %9 = vector.shape_cast %8 : vector<8x8xf32> to vector<8x8x1xf32>
    %10 = tpu.iota {dimensions = array<i32: 0>} : vector<8x8x1xi32>
    %c7_i32 = arith.constant 7 : i32
    %11 = vector.broadcast %c7_i32 : i32 to vector<8x8x1xi32>
    %12 = arith.cmpi slt, %10, %11 : vector<8x8x1xi32>
    %cst_5 = arith.constant 0xFF800000 : f32
    %13 = vector.broadcast %cst_5 : f32 to vector<8x8x1xf32>
    %14 = arith.select %12, %9, %13 : vector<8x8x1xi1>, vector<8x8x1xf32>
    %cst_6 = arith.constant dense<0xFF800000> : vector<8x1xf32>
    %15 = vector.multi_reduction <maximumf>, %14, %cst_6 [0] : vector<8x8x1xf32> to vector<8x1xf32>
    %16 = vector.shape_cast %15 : vector<8x1xf32> to vector<1x8x1xf32>
    %17 = vector.broadcast %16 : vector<1x8x1xf32> to vector<8x8x1xf32>
    %18 = arith.subf %14, %17 : vector<8x8x1xf32>
    %19 = math.exp %18 : vector<8x8x1xf32>
    %cst_7 = arith.constant dense<0.000000e+00> : vector<8x1xf32>
    %20 = vector.multi_reduction <add>, %19, %cst_7 [0] : vector<8x8x1xf32> to vector<8x1xf32>
    %21 = vector.shape_cast %20 : vector<8x1xf32> to vector<1x8x1xf32>
    %22 = vector.broadcast %21 : vector<1x8x1xf32> to vector<8x8x1xf32>
    %23 = arith.divf %19, %22 : vector<8x8x1xf32>
    %24 = vector.broadcast %23 : vector<8x8x1xf32> to vector<8x8x128xf32>
    %25 = arith.mulf %24, %0 : vector<8x8x128xf32>
    %cst_8 = arith.constant dense<0.000000e+00> : vector<8x128xf32>
    %26 = vector.multi_reduction <add>, %25, %cst_8 [0] : vector<8x8x128xf32> to vector<8x128xf32>
    %c0_9 = arith.constant 0 : index
    %c0_10 = arith.constant 0 : index
    %c0_11 = arith.constant 0 : index
    %27 = vector.load %arg3[%c0_9, %c0_10, %c0_11] : memref<2x128x128xf32, #tpu.memory_space<vmem>>, vector<1x128x128xf32>
    %28 = vector.shape_cast %27 : vector<1x128x128xf32> to vector<128x128xf32>
    %cst_12 = arith.constant dense<0.000000e+00> : vector<8x128xf32>
    %29 = tpu.matmul %2, %28, %cst_12 {dimension_numbers = #tpu.dot_dimension_numbers<[1], [0], [0], [1], [0, 0, 1, 1], [], []>} : vector<8x128xf32>, vector<128x128xf32>, vector<8x128xf32> -> vector<8x128xf32>
    %c1 = arith.constant 1 : index
    %c0_13 = arith.constant 0 : index
    %c0_14 = arith.constant 0 : index
    %30 = vector.load %arg3[%c1, %c0_13, %c0_14] : memref<2x128x128xf32, #tpu.memory_space<vmem>>, vector<1x128x128xf32>
    %31 = vector.shape_cast %30 : vector<1x128x128xf32> to vector<128x128xf32>
    %cst_15 = arith.constant dense<0.000000e+00> : vector<8x128xf32>
    %32 = tpu.matmul %26, %31, %cst_15 {dimension_numbers = #tpu.dot_dimension_numbers<[1], [0], [0], [1], [0, 0, 1, 1], [], []>} : vector<8x128xf32>, vector<128x128xf32>, vector<8x128xf32> -> vector<8x128xf32>
    %33 = arith.addf %29, %32 : vector<8x128xf32>
    %c0_16 = arith.constant 0 : index
    %c0_17 = arith.constant 0 : index
    %34 = vector.load %arg4[%c0_16, %c0_17] : memref<1x128xf32, #tpu.memory_space<vmem>>, vector<1x128xf32>
    %35 = vector.broadcast %34 : vector<1x128xf32> to vector<8x128xf32>
    %36 = arith.addf %33, %35 : vector<8x128xf32>
    %37 = arith.negf %36 : vector<8x128xf32>
    %38 = math.exp %37 : vector<8x128xf32>
    %cst_18 = arith.constant 1.000000e+00 : f32
    %39 = vector.broadcast %cst_18 : f32 to vector<8x128xf32>
    %40 = arith.addf %39, %38 : vector<8x128xf32>
    %41 = arith.divf %39, %40 : vector<8x128xf32>
    %c0_19 = arith.constant 0 : index
    %c0_20 = arith.constant 0 : index
    %42 = vector.load %arg5[%c0_19, %c0_20] : memref<8x128xf32, #tpu.memory_space<vmem>>, vector<8x128xf32>
    tpu.vector_store %arg5[%c0_19, %c0_20], %41 {strides = array<i32>} : memref<8x128xf32, #tpu.memory_space<vmem>>, vector<8x128xf32>,
    return
  }
  func.func @transform_0(%arg0: i32) -> (i32, i32, i32) {
    %c0_i32 = arith.constant 0 : i32
    %c0_i32_0 = arith.constant 0 : i32
    %c0_i32_1 = arith.constant 0 : i32
    return %c0_i32, %arg0, %c0_i32_0 : i32, i32, i32
  }
  func.func @transform_1(%arg0: i32) -> (i32, i32) {
    %c0_i32 = arith.constant 0 : i32
    %c0_i32_0 = arith.constant 0 : i32
    %c0_i32_1 = arith.constant 0 : i32
    return %c0_i32, %c0_i32_0 : i32, i32
  }
  func.func @transform_2(%arg0: i32) -> (i32, i32, i32) {
    %c0_i32 = arith.constant 0 : i32
    %c0_i32_0 = arith.constant 0 : i32
    %c0_i32_1 = arith.constant 0 : i32
    %c0_i32_2 = arith.constant 0 : i32
    return %c0_i32, %c0_i32_0, %c0_i32_1 : i32, i32, i32
  }
  func.func @transform_3(%arg0: i32) -> (i32, i32) {
    %c0_i32 = arith.constant 0 : i32
    %c0_i32_0 = arith.constant 0 : i32
    %c0_i32_1 = arith.constant 0 : i32
    return %c0_i32, %c0_i32_0 : i32, i32
  }
  func.func @transform_4(%arg0: i32) -> (i32, i32) {
    %c0_i32 = arith.constant 0 : i32
    %c0_i32_0 = arith.constant 0 : i32
    return %arg0, %c0_i32 : i32, i32
  }
}

</mosaic_0001>

<bundles_post_ra>
// kernel: dip_g_forward.3
= control target key start
LH: loop header
LB: loop body
LE: loop exit
PB: predicated region body
PF: predicated region fallthrough
CT: control target
= control target key end

     0   :  { %v363_v3 = vmov 0.0   ;;  %vm45_vm0 = vcmask 130048   ;;  %v30_v15 = vlaneseq  ;;  %s537_s1 = inlined_call_operand.vmem [shape: f32[16,384], index: 1, kind: input, shape index: {}]   ;;  %s538_s0 = inlined_call_operand.vmem [shape: f32[64,16], index: 0, kind: input, shape index: {}]   ;;  %s539_s2 = inlined_call_operand.vmem [shape: f32[1,384], index: 2, kind: input, shape index: {}]   ;;  %s540_s3 = inlined_call_operand.vmem [shape: f32[64,384], index: 3, kind: output, shape index: {}]  }
   0x1   :  { %v26_v0 = vld [vmem:[%s537_s1 + $0x20] sm:$0xff]  ;;  %v25_v1 = vld [vmem:[%s537_s1 + $0x18] sm:$0xff]  ;;  %v23_v2 = vld [vmem:[%s537_s1 + $0x8] sm:$0xff]  ;;  %134 = vmatprep.mubr.f32.mxu0 %v363_v3  ;;  %170 = vmatprep.mubr.f32.mxu1 %v363_v3 }
   0x2   :  { %98 = vmatprep.subr.mxu0 %v26_v0  ;;  %358 = vmatprep.subr.mxu1 %v26_v0  ;;  %v22_v4 = vld [vmem:[%s537_s1] sm:$0xff]  ;;  %v20_v6 = vld [vmem:[%s538_s0 + $0x30] sm:$0xff]  ;;  %v27_v7 = vld [vmem:[%s537_s1 + $0x28] sm:$0xff]  ;;  %v31_v16 = vshrl.u32 %v30_v15, 7 }
   0x3   :  { %99 = vmatpush1.msra.mxu0 %v25_v1  ;;  %360 = vmatpush1.msra.mxu1 %v25_v1  ;;  %v14_v5 = vld [vmem:[%s538_s0] sm:$0xff]  ;;  %v24_v8 = vld [vmem:[%s537_s1 + $0x10] sm:$0xff]  ;;  %v15_v9 = vld [vmem:[%s538_s0 + $0x8] sm:$0xff] }
   0x4   :  { %100 = vmatprep.subr.mxu0 %v23_v2  ;;  %359 = vmatprep.subr.mxu1 %v23_v2  ;;  %v21_v10 = vld [vmem:[%s538_s0 + $0x38] sm:$0xff]  ;;  %v16_v11 = vld [vmem:[%s538_s0 + $0x10] sm:$0xff]  ;;  %v18_v13 = vld [vmem:[%s538_s0 + $0x20] sm:$0xff]  ;;  %v32_v17 = vsub.s32 0, %v31_v16  ;;  %v36_v19 = vsub.s32 1, %v31_v16  ;;  %v40_v26 = vsub.s32 2, %v31_v16 }
   0x5   :  { %101 = vmatpush1.msra.mxu0 %v22_v4  ;;  %361 = vmatpush1.msra.mxu1 %v22_v4  ;;  %v17_v12 = vld [vmem:[%s538_s0 + $0x18] sm:$0xff]  ;;  %v19_v14 = vld [vmem:[%s538_s0 + $0x28] sm:$0xff]  ;;  %v28_v18 = vld [vmem:[%s539_s2] sm:$0x7] }
   0x6   :  { %316 = vmatmul.mubr.msk.f32.vlgmr.msra.gmra.mxu0 %vm45_vm0, %v14_v5  ;;  %322 = vmatmul.mubr.msk.f32.vlgmr.msra.gmra.mxu1 %vm45_vm0, %v20_v6  ;;  %v445_v20 = vrot.slane %v28_v18, %v32_v17  ;;  %v447_v21 = vrot.slane %v28_v18, %v36_v19  ;;  %v41_v35 = vrot.slane %v28_v18, %v40_v26 }
   0x7   :  { %342 = vmatprep.subr.mxu1 %v27_v7  ;;  %140 = vmatprep.mubr.f32.mxu0 %v363_v3 }
   0x8   :  { %343 = vmatpush3.msra.mxu1 %v27_v7  ;;  %176 = vmatprep.mubr.f32.mxu1 %v363_v3 }
   0x9   :  { %344 = vmatprep.subr.mxu1 %v24_v8 }
   0xa   :  { %317 = vmatmul.mubr.msk.f32.gmra.mxu0 %vm45_vm0, %v15_v9  ;;  %323 = vmatmul.mubr.msk.f32.gmra.mxu1 %vm45_vm0, %v21_v10 }
   0xb   :  { %345 = vmatpush3.msra.mxu1 %v24_v8  ;;  %146 = vmatprep.mubr.f32.mxu0 %v363_v3 }
   0xc   :  { %346 = vmatprep.mubr.msk.f32.mxu1 %vm45_vm0, %v14_v5 }
   0xe   :  { %318 = vmatmul.mubr.msk.f32.gmra.mxu0 %vm45_vm0, %v16_v11  ;;  %347 = vmatmul.mubr.msk.f32.vlgmr.msra.gmra.mxu1 %vm45_vm0, %v15_v9 }
   0xf   :  { %152 = vmatprep.mubr.f32.mxu0 %v363_v3  ;;  %349 = vmatprep.mubr.msk.f32.mxu1 %vm45_vm0, %v16_v11 }
  0x12   :  { %319 = vmatmul.mubr.msk.f32.gmra.mxu0 %vm45_vm0, %v17_v12  ;;  %350 = vmatmul.mubr.msk.f32.gmra.mxu1 %vm45_vm0, %v17_v12 }
  0x13   :  { %158 = vmatprep.mubr.f32.mxu0 %v363_v3  ;;  %352 = vmatprep.mubr.msk.f32.mxu1 %vm45_vm0, %v18_v13 }
  0x16   :  { %320 = vmatmul.mubr.msk.f32.gmra.mxu0 %vm45_vm0, %v18_v13  ;;  %353 = vmatmul.mubr.msk.f32.gmra.mxu1 %vm45_vm0, %v19_v14 }
  0x17   :  { %164 = vmatprep.mubr.f32.mxu0 %v363_v3  ;;  %355 = vmatprep.mubr.msk.f32.mxu1 %vm45_vm0, %v20_v6 }
  0x1a   :  { %321 = vmatmul.mubr.msk.f32.gmra.mxu0 %vm45_vm0, %v19_v14  ;;  %356 = vmatmul.mubr.msk.f32.gmra.mxu1 %vm45_vm0, %v21_v10 }
  0xc6   :  { %v136_v22 = vpop.f32.mrf.mxu0  ;;  %v172_v23 = vpop.f32.mrf.mxu1 }
  0xc7   :  { %v137_v24 = vadd.f32 %v136_v22, %v445_v20  ;;  %v173_v25 = vadd.f32 %v172_v23, %v445_v20 }
  0xc8   :  { %v138_v27 = vpop.f32.mrf.mxu0  ;;  %v174_v28 = vpop.f32.mrf.mxu1 }
  0xc9   :  { %288 = vst [vmem:[%s540_s3] sm:$0xff] %v137_v24  ;;  %306 = vst [vmem:[%s540_s3 + $0x90] sm:$0xff] %v173_v25  ;;  %v139_v29 = vadd.f32 %v138_v27, %v447_v21  ;;  %v175_v30 = vadd.f32 %v174_v28, %v447_v21 }
  0xca   :  { %v142_v31 = vpop.f32.mrf.mxu0  ;;  %v178_v32 = vpop.f32.mrf.mxu1 }
  0xcb   :  { %289 = vst [vmem:[%s540_s3 + $0x8] sm:$0xff] %v139_v29  ;;  %307 = vst [vmem:[%s540_s3 + $0x98] sm:$0xff] %v175_v30  ;;  %v143_v33 = vadd.f32 %v142_v31, %v445_v20  ;;  %v179_v34 = vadd.f32 %v178_v32, %v445_v20 }
  0xcc   :  { %v144_v36 = vpop.f32.mrf.mxu0  ;;  %v180_v37 = vpop.f32.mrf.mxu1 }
  0xcd   :  { %291 = vst [vmem:[%s540_s3 + $0x18] sm:$0xff] %v143_v33  ;;  %309 = vst [vmem:[%s540_s3 + $0xa8] sm:$0xff] %v179_v34  ;;  %v145_v38 = vadd.f32 %v144_v36, %v447_v21  ;;  %v181_v39 = vadd.f32 %v180_v37, %v447_v21 }
  0xce   :  { %v148_v40 = vpop.f32.mrf.mxu0  ;;  %v348_v41 = vpop.f32.mrf.mxu1 }
  0xcf   :  { %292 = vst [vmem:[%s540_s3 + $0x20] sm:$0xff] %v145_v38  ;;  %310 = vst [vmem:[%s540_s3 + $0xb0] sm:$0xff] %v181_v39  ;;  %v149_v42 = vadd.f32 %v148_v40, %v445_v20  ;;  %v255_v43 = vadd.f32 %v348_v41, %v41_v35 }
  0xd0   :  { %v150_v44 = vpop.f32.mrf.mxu0  ;;  %v249_v45 = vpop.f32.mrf.mxu1 }
  0xd1   :  { %294 = vst [vmem:[%s540_s3 + $0x30] sm:$0xff] %v149_v42  ;;  %293 = vst [vmem:[%s540_s3 + $0x28] sm:$0xff] %v255_v43  ;;  %v151_v46 = vadd.f32 %v150_v44, %v447_v21  ;;  %v250_v47 = vadd.f32 %v249_v45, %v41_v35 }
  0xd2   :  { %v154_v48 = vpop.f32.mrf.mxu0  ;;  %v351_v49 = vpop.f32.mrf.mxu1 }
  0xd3   :  { %295 = vst [vmem:[%s540_s3 + $0x38] sm:$0xff] %v151_v46  ;;  %290 = vst [vmem:[%s540_s3 + $0x10] sm:$0xff] %v250_v47  ;;  %v155_v50 = vadd.f32 %v154_v48, %v445_v20  ;;  %v265_v51 = vadd.f32 %v351_v49, %v41_v35 }
  0xd4   :  { %v156_v52 = vpop.f32.mrf.mxu0  ;;  %v259_v53 = vpop.f32.mrf.mxu1 }
  0xd5   :  { %297 = vst [vmem:[%s540_s3 + $0x48] sm:$0xff] %v155_v50  ;;  %299 = vst [vmem:[%s540_s3 + $0x58] sm:$0xff] %v265_v51  ;;  %v157_v54 = vadd.f32 %v156_v52, %v447_v21  ;;  %v260_v55 = vadd.f32 %v259_v53, %v41_v35 }
  0xd6   :  { %v160_v56 = vpop.f32.mrf.mxu0  ;;  %v354_v57 = vpop.f32.mrf.mxu1 }
  0xd7   :  { %298 = vst [vmem:[%s540_s3 + $0x50] sm:$0xff] %v157_v54  ;;  %296 = vst [vmem:[%s540_s3 + $0x40] sm:$0xff] %v260_v55  ;;  %v161_v58 = vadd.f32 %v160_v56, %v445_v20  ;;  %v275_v59 = vadd.f32 %v354_v57, %v41_v35 }
  0xd8   :  { %v162_v60 = vpop.f32.mrf.mxu0  ;;  %v269_v61 = vpop.f32.mrf.mxu1 }
  0xd9   :  { %300 = vst [vmem:[%s540_s3 + $0x60] sm:$0xff] %v161_v58  ;;  %305 = vst [vmem:[%s540_s3 + $0x88] sm:$0xff] %v275_v59  ;;  %v163_v62 = vadd.f32 %v162_v60, %v447_v21  ;;  %v270_v63 = vadd.f32 %v269_v61, %v41_v35 }
  0xda   :  { %v166_v0 = vpop.f32.mrf.mxu0  ;;  %v357_v1 = vpop.f32.mrf.mxu1 }
  0xdb   :  { %301 = vst [vmem:[%s540_s3 + $0x68] sm:$0xff] %v163_v62  ;;  %302 = vst [vmem:[%s540_s3 + $0x70] sm:$0xff] %v270_v63  ;;  %v167_v2 = vadd.f32 %v166_v0, %v445_v20  ;;  %v285_v3 = vadd.f32 %v357_v1, %v41_v35 }
  0xdc   :  { %v168_v4 = vpop.f32.mrf.mxu0  ;;  %v279_v5 = vpop.f32.mrf.mxu1 }
  0xdd   :  { %303 = vst [vmem:[%s540_s3 + $0x78] sm:$0xff] %v167_v2  ;;  %311 = vst [vmem:[%s540_s3 + $0xb8] sm:$0xff] %v285_v3  ;;  %v169_v6 = vadd.f32 %v168_v4, %v447_v21  ;;  %v280_v7 = vadd.f32 %v279_v5, %v41_v35 }
  0xdf   :  { %304 = vst [vmem:[%s540_s3 + $0x80] sm:$0xff] %v169_v6  ;;  %308 = vst [vmem:[%s540_s3 + $0xa0] sm:$0xff] %v280_v7 }

// kernel: dip_g_forward.5
= control target key start
LH: loop header
LB: loop body
LE: loop exit
PB: predicated region body
PF: predicated region fallthrough
CT: control target
= control target key end

     0   :  { %v595_v0 = vmov 0.0   ;;  %vm596_vm0 = vmmov 0   ;;  %s883_s1 = inlined_call_operand.vmem [shape: f32[128,128], index: 1, kind: input, shape index: {}]   ;;  %s884_s0 = inlined_call_operand.vmem [shape: f32[8,8,128], index: 0, kind: input, shape index: {}]   ;;  %s885_s2 = inlined_call_operand.vmem [shape: f32[2,128,128], index: 2, kind: input, shape index: {}]   ;;  %s886_s3 = inlined_call_operand.vmem [shape: f32[1,128], index: 3, kind: input, shape index: {}]   ;;  %s887_s4 = inlined_call_operand.vmem [shape: f32[8,128], index: 4, kind: output, shape index: {}]  }
   0x1   :  { %466 = vmatprep.subr.mxu0 %v595_v0  ;;  %v40_v1 = vld [vmem:[%s883_s1 + $0x78] sm:$0xff]  ;;  %v39_v2 = vld [vmem:[%s883_s1 + $0x70] sm:$0xff]  ;;  %498 = vmatprep.mubr.msk.f32.mxu0 %vm596_vm0, %v595_v0  ;;  %v38_v3 = vld [vmem:[%s883_s1 + $0x68] sm:$0xff] }
   0x2   :  { %467 = vmatpush3.msra.mxu0 %v40_v1  ;;  %501 = vmatprep.subr.mxu1 %v595_v0  ;;  %v37_v4 = vld [vmem:[%s883_s1 + $0x60] sm:$0xff]  ;;  %v36_v5 = vld [vmem:[%s883_s1 + $0x58] sm:$0xff]  ;;  %v35_v6 = vld [vmem:[%s883_s1 + $0x50] sm:$0xff] }
   0x3   :  { %468 = vmatprep.subr.mxu0 %v595_v0  ;;  %533 = vmatprep.mubr.msk.f32.mxu1 %vm596_vm0, %v595_v0  ;;  %v34_v7 = vld [vmem:[%s883_s1 + $0x48] sm:$0xff]  ;;  %v33_v8 = vld [vmem:[%s883_s1 + $0x40] sm:$0xff]  ;;  %v32_v9 = vld [vmem:[%s883_s1 + $0x38] sm:$0xff] }
   0x4   :  { %469 = vmatpush3.msra.mxu0 %v39_v2  ;;  %v31_v10 = vld [vmem:[%s883_s1 + $0x30] sm:$0xff]  ;;  %v30_v11 = vld [vmem:[%s883_s1 + $0x28] sm:$0xff]  ;;  %v29_v12 = vld [vmem:[%s883_s1 + $0x20] sm:$0xff] }
   0x5   :  { %470 = vmatprep.subr.mxu0 %v595_v0  ;;  %v28_v13 = vld [vmem:[%s883_s1 + $0x18] sm:$0xff]  ;;  %v27_v14 = vld [vmem:[%s883_s1 + $0x10] sm:$0xff]  ;;  %v26_v15 = vld [vmem:[%s883_s1 + $0x8] sm:$0xff] }
   0x6   :  { %471 = vmatpush3.msra.mxu0 %v38_v3  ;;  %v25_v16 = vld [vmem:[%s883_s1] sm:$0xff]  ;;  %v693_v17 = vld [vmem:[%s884_s0 + $0x38] sm:$0xff]  ;;  %v703_v18 = vld [vmem:[%s884_s0 + $0x10] sm:$0xff] }
   0x7   :  { %472 = vmatprep.subr.mxu0 %v595_v0  ;;  %v708_v19 = vld [vmem:[%s884_s0] sm:$0xff]  ;;  %v720_v25 = vld [vmem:[%s884_s0 + $0x8] sm:$0xff]  ;;  %v727_v28 = vld [vmem:[%s884_s0 + $0x30] sm:$0xff] }
   0x8   :  { %473 = vmatpush3.msra.mxu0 %v37_v4  ;;  %v715_v24 = vld [vmem:[%s884_s0 + $0x20] sm:$0xff]  ;;  %v732_v29 = vld [vmem:[%s884_s0 + $0x28] sm:$0xff]  ;;  %v739_v32 = vld [vmem:[%s884_s0 + $0x18] sm:$0xff] }
   0x9   :  { %474 = vmatprep.subr.mxu0 %v595_v0  ;;  %v220_v34 = vld [vmem:[%s885_s2 + $0x78] sm:$0xff]  ;;  %v219_v36 = vld [vmem:[%s885_s2 + $0x70] sm:$0xff]  ;;  %v218_v38 = vld [vmem:[%s885_s2 + $0x68] sm:$0xff] }
   0xa   :  { %475 = vmatpush3.msra.mxu0 %v36_v5  ;;  %v412_v35 = vld [vmem:[%s885_s2 + $0xf8] sm:$0xff]  ;;  %v411_v37 = vld [vmem:[%s885_s2 + $0xf0] sm:$0xff]  ;;  %v410_v39 = vld [vmem:[%s885_s2 + $0xe8] sm:$0xff] }
   0xb   :  { %476 = vmatprep.subr.mxu0 %v595_v0  ;;  %502 = vmatpush3.msra.mxu1 %v412_v35  ;;  %v217_v40 = vld [vmem:[%s885_s2 + $0x60] sm:$0xff]  ;;  %v216_v42 = vld [vmem:[%s885_s2 + $0x58] sm:$0xff]  ;;  %v215_v44 = vld [vmem:[%s885_s2 + $0x50] sm:$0xff] }
   0xc   :  { %477 = vmatpush3.msra.mxu0 %v35_v6  ;;  %503 = vmatprep.subr.mxu1 %v595_v0  ;;  %v409_v41 = vld [vmem:[%s885_s2 + $0xe0] sm:$0xff]  ;;  %v408_v43 = vld [vmem:[%s885_s2 + $0xd8] sm:$0xff]  ;;  %v407_v45 = vld [vmem:[%s885_s2 + $0xd0] sm:$0xff] }
   0xd   :  { %478 = vmatprep.subr.mxu0 %v595_v0  ;;  %504 = vmatpush3.msra.mxu1 %v411_v37  ;;  %v214_v46 = vld [vmem:[%s885_s2 + $0x48] sm:$0xff]  ;;  %v213_v48 = vld [vmem:[%s885_s2 + $0x40] sm:$0xff]  ;;  %v212_v50 = vld [vmem:[%s885_s2 + $0x38] sm:$0xff] }
   0xe   :  { %479 = vmatpush3.msra.mxu0 %v34_v7  ;;  %505 = vmatprep.subr.mxu1 %v595_v0  ;;  %v406_v47 = vld [vmem:[%s885_s2 + $0xc8] sm:$0xff]  ;;  %v405_v49 = vld [vmem:[%s885_s2 + $0xc0] sm:$0xff]  ;;  %v404_v51 = vld [vmem:[%s885_s2 + $0xb8] sm:$0xff] }
   0xf   :  { %480 = vmatprep.subr.mxu0 %v595_v0  ;;  %506 = vmatpush3.msra.mxu1 %v410_v39  ;;  %v211_v52 = vld [vmem:[%s885_s2 + $0x30] sm:$0xff]  ;;  %v210_v54 = vld [vmem:[%s885_s2 + $0x28] sm:$0xff]  ;;  %v209_v56 = vld [vmem:[%s885_s2 + $0x20] sm:$0xff] }
  0x10   :  { %481 = vmatpush3.msra.mxu0 %v33_v8  ;;  %507 = vmatprep.subr.mxu1 %v595_v0  ;;  %v403_v53 = vld [vmem:[%s885_s2 + $0xb0] sm:$0xff]  ;;  %v402_v55 = vld [vmem:[%s885_s2 + $0xa8] sm:$0xff]  ;;  %v401_v57 = vld [vmem:[%s885_s2 + $0xa0] sm:$0xff] }
  0x11   :  { %482 = vmatprep.subr.mxu0 %v595_v0  ;;  %508 = vmatpush3.msra.mxu1 %v409_v41  ;;  %v208_v58 = vld [vmem:[%s885_s2 + $0x18] sm:$0xff]  ;;  %v207_v60 = vld [vmem:[%s885_s2 + $0x10] sm:$0xff]  ;;  %v206_v62 = vld [vmem:[%s885_s2 + $0x8] sm:$0xff] }
  0x12   :  { %483 = vmatpush3.msra.mxu0 %v32_v9  ;;  %509 = vmatprep.subr.mxu1 %v595_v0  ;;  %v400_v59 = vld [vmem:[%s885_s2 + $0x98] sm:$0xff]  ;;  %v399_v61 = vld [vmem:[%s885_s2 + $0x90] sm:$0xff]  ;;  %v398_v63 = vld [vmem:[%s885_s2 + $0x88] sm:$0xff] }
  0x13   :  { %484 = vmatprep.subr.mxu0 %v595_v0  ;;  %510 = vmatpush3.msra.mxu1 %v408_v43  ;;  %v205_v1 = vld [vmem:[%s885_s2] sm:$0xff] }
  0x14   :  { %485 = vmatpush3.msra.mxu0 %v31_v10  ;;  %511 = vmatprep.subr.mxu1 %v595_v0  ;;  %v397_v2 = vld [vmem:[%s885_s2 + $0x80] sm:$0xff] }
  0x15   :  { %486 = vmatprep.subr.mxu0 %v595_v0  ;;  %512 = vmatpush3.msra.mxu1 %v407_v45 }
  0x16   :  { %487 = vmatpush3.msra.mxu0 %v30_v11  ;;  %513 = vmatprep.subr.mxu1 %v595_v0 }
  0x17   :  { %488 = vmatprep.subr.mxu0 %v595_v0  ;;  %514 = vmatpush3.msra.mxu1 %v406_v47 }
  0x18   :  { %489 = vmatpush3.msra.mxu0 %v29_v12  ;;  %515 = vmatprep.subr.mxu1 %v595_v0 }
  0x19   :  { %490 = vmatprep.subr.mxu0 %v595_v0  ;;  %516 = vmatpush3.msra.mxu1 %v405_v49 }
  0x1a   :  { %491 = vmatpush3.msra.mxu0 %v28_v13  ;;  %517 = vmatprep.subr.mxu1 %v595_v0 }
  0x1b   :  { %492 = vmatprep.subr.mxu0 %v595_v0  ;;  %518 = vmatpush3.msra.mxu1 %v404_v51 }
  0x1c   :  { %493 = vmatpush3.msra.mxu0 %v27_v14  ;;  %519 = vmatprep.subr.mxu1 %v595_v0 }
  0x1d   :  { %494 = vmatprep.subr.mxu0 %v595_v0  ;;  %520 = vmatpush3.msra.mxu1 %v403_v53 }
  0x1e   :  { %495 = vmatpush3.msra.mxu0 %v26_v15  ;;  %521 = vmatprep.subr.mxu1 %v595_v0 }
  0x1f   :  { %496 = vmatprep.subr.mxu0 %v595_v0  ;;  %522 = vmatpush3.msra.mxu1 %v402_v55 }
  0x20   :  { %497 = vmatpush3.msra.mxu0 %v25_v16  ;;  %523 = vmatprep.subr.mxu1 %v595_v0 }
  0x21   :  { %499 = vmatmul.mubr.f32.vlgmr.msra.gmra.mxu0 %v693_v17  ;;  %536 = vmatprep.subr.mxu0 %v595_v0 }
  0x22   :  { %568 = vmatprep.mubr.msk.f32.mxu0 %vm596_vm0, %v595_v0  ;;  %537 = vmatpush3.msra.mxu0 %v220_v34 }
  0x23   :  { %538 = vmatprep.subr.mxu0 %v595_v0  ;;  %524 = vmatpush3.msra.mxu1 %v401_v57 }
  0x24   :  { %539 = vmatpush3.msra.mxu0 %v219_v36  ;;  %525 = vmatprep.subr.mxu1 %v595_v0 }
  0x25   :  { %540 = vmatprep.subr.mxu0 %v595_v0  ;;  %526 = vmatpush3.msra.mxu1 %v400_v59 }
  0x26   :  { %541 = vmatpush3.msra.mxu0 %v218_v38  ;;  %527 = vmatprep.subr.mxu1 %v595_v0 }
  0x27   :  { %542 = vmatprep.subr.mxu0 %v595_v0  ;;  %528 = vmatpush3.msra.mxu1 %v399_v61 }
  0x28   :  { %543 = vmatpush3.msra.mxu0 %v217_v40  ;;  %529 = vmatprep.subr.mxu1 %v595_v0 }
  0x29   :  { %544 = vmatprep.subr.mxu0 %v595_v0  ;;  %530 = vmatpush3.msra.mxu1 %v398_v63 }
  0x2a   :  { %545 = vmatpush3.msra.mxu0 %v216_v42  ;;  %531 = vmatprep.subr.mxu1 %v595_v0 }
  0x2b   :  { %546 = vmatprep.subr.mxu0 %v595_v0  ;;  %532 = vmatpush3.msra.mxu1 %v397_v2 }
  0x2c   :  { %547 = vmatpush3.msra.mxu0 %v215_v44 }
  0x2d   :  { %548 = vmatprep.subr.mxu0 %v595_v0 }
  0x2e   :  { %549 = vmatpush3.msra.mxu0 %v214_v46 }
  0x2f   :  { %550 = vmatprep.subr.mxu0 %v595_v0 }
  0x30   :  { %551 = vmatpush3.msra.mxu0 %v213_v48 }
  0x31   :  { %552 = vmatprep.subr.mxu0 %v595_v0 }
  0x32   :  { %553 = vmatpush3.msra.mxu0 %v212_v50 }
  0x33   :  { %554 = vmatprep.subr.mxu0 %v595_v0 }
  0x34   :  { %555 = vmatpush3.msra.mxu0 %v211_v52 }
  0x35   :  { %556 = vmatprep.subr.mxu0 %v595_v0 }
  0x36   :  { %557 = vmatpush3.msra.mxu0 %v210_v54 }
  0x37   :  { %558 = vmatprep.subr.mxu0 %v595_v0 }
  0x38   :  { %559 = vmatpush3.msra.mxu0 %v209_v56 }
  0x39   :  { %560 = vmatprep.subr.mxu0 %v595_v0 }
  0x3a   :  { %561 = vmatpush3.msra.mxu0 %v208_v58 }
  0x3b   :  { %562 = vmatprep.subr.mxu0 %v595_v0 }
  0x3c   :  { %563 = vmatpush3.msra.mxu0 %v207_v60 }
  0x3d   :  { %564 = vmatprep.subr.mxu0 %v595_v0 }
  0x3e   :  { %565 = vmatpush3.msra.mxu0 %v206_v62 }
  0x3f   :  { %566 = vmatprep.subr.mxu0 %v595_v0 }
  0x40   :  { %567 = vmatpush3.msra.mxu0 %v205_v1 }
  0x41   :  { %569 = vmatmul.mubr.f32.vlgmr.msra.gmra.mxu0 %v693_v17 }
  0xe1   :  { %v107_v20 = vpop.f32.mrf.mxu0 }
  0xe2   :  { %v113_v21 = vmul.f32 %v107_v20, %v703_v18  ;;  %v111_v22 = vmul.f32 %v107_v20, %v708_v19  ;;  %v115_v26 = vmul.f32 %v107_v20, %v715_v24  ;;  %v112_v27 = vmul.f32 %v107_v20, %v720_v25 }
  0xe3   :  { %v500_v23 = vpop.f32.mrf.mxu0  ;;  %v117_v30 = vmul.f32 %v107_v20, %v727_v28  ;;  %v116_v31 = vmul.f32 %v107_v20, %v732_v29  ;;  %v114_v33 = vmul.f32 %v107_v20, %v739_v32 }
  0xe4   :  { %123 = vadd.xlane.f32.xlu1 %v113_v21  ;;  %119 = vadd.xlane.f32.xlu0 %v111_v22 }
  0xe8   :  { %127 = vadd.xlane.f32.xlu1 %v115_v26  ;;  %121 = vadd.xlane.f32.xlu0 %v112_v27 }
  0xec   :  { %131 = vadd.xlane.f32.xlu1 %v117_v30  ;;  %129 = vadd.xlane.f32.xlu0 %v116_v31 }
  0xf0   :  { %125 = vadd.xlane.f32.xlu0 %v114_v33 }
 0x16d   :  { %v124_v3 = vpop.xlane.xlu1 %123  ;;  %v120_v4 = vpop.xlane.xlu0 %119 }
 0x171   :  { %v128_v5 = vpop.xlane.xlu1 %127  ;;  %v122_v6 = vpop.xlane.xlu0 %121 }
 0x172   :  { %v143_v10 = vmax.f32 %v120_v4, %v128_v5 }
 0x175   :  { %v132_v7 = vpop.xlane.xlu1 %131  ;;  %v130_v8 = vpop.xlane.xlu0 %129 }
 0x176   :  { %v144_v9 = vmax.f32 %v122_v6, %v130_v8  ;;  %v145_v11 = vmax.f32 %v124_v3, %v132_v7 }
 0x178   :  { %v147_v13 = vmax.f32 %v143_v10, %v144_v9 }
 0x179   :  { %v126_v12 = vpop.xlane.xlu0 %125 }
 0x17a   :  { %v148_v14 = vmax.f32 %v145_v11, %v126_v12 }
 0x17c   :  { %v149_v15 = vmax.f32 %v147_v13, %v148_v14 }
 0x17e   :  { %v150_v16 = vsub.f32 %v120_v4, %v149_v15  ;;  %v151_v20 = vsub.f32 %v122_v6, %v149_v15  ;;  %v152_v21 = vsub.f32 %v124_v3, %v149_v15  ;;  %v153_v0 = vsub.f32 %v126_v12, %v149_v15  ;;  %v374_v12 = vpop.f32.mrf.mxu0 }
 0x17f   :  { %v154_v26 = vsub.f32 %v128_v5, %v149_v15  ;;  %v155_v30 = vsub.f32 %v130_v8, %v149_v15  ;;  %v156_v33 = vsub.f32 %v132_v7, %v149_v15  ;;  %v157_v35 = vsub.f32 -inf, %v149_v15 }
 0x180   :  { %v158_v22 = vmul.f32 1.442695, %v150_v16  ;;  %v160_v23 = vmul.f32 1.442695, %v151_v20  ;;  %v162_v27 = vmul.f32 1.442695, %v152_v21  ;;  %v570_v13 = vpop.f32.mrf.mxu0 }
 0x181   :  { %v164_v31 = vmul.f32 1.442695, %v153_v0  ;;  %v166_v34 = vmul.f32 1.442695, %v154_v26  ;;  %v168_v36 = vmul.f32 1.442695, %v155_v30 }
 0x182   :  { %573 = vpow2.f32 %v158_v22  ;;  %v170_v37 = vmul.f32 1.442695, %v156_v33  ;;  %v172_v38 = vmul.f32 1.442695, %v157_v35 }
 0x183   :  { %575 = vpow2.f32 %v160_v23 }
 0x184   :  { %577 = vpow2.f32 %v162_v27 }
 0x185   :  { %579 = vpow2.f32 %v164_v31 }
 0x186   :  { %581 = vpow2.f32 %v166_v34 }
 0x187   :  { %583 = vpow2.f32 %v168_v36 }
 0x188   :  { %585 = vpow2.f32 %v170_v37 }
 0x189   :  { %587 = vpow2.f32 %v172_v38 }
 0x18f   :  { %v574_v39 = vpop.eup %573 }
 0x190   :  { %v576_v40 = vpop.eup %575 }
 0x191   :  { %v174_v41 = vadd.f32 %v576_v40, %v574_v39  ;;  %v578_v42 = vpop.eup %577 }
 0x192   :  { %v580_v44 = vpop.eup %579 }
 0x193   :  { %v175_v43 = vadd.f32 %v578_v42, %v174_v41  ;;  %v582_v46 = vpop.eup %581 }
 0x194   :  { %v584_v48 = vpop.eup %583 }
 0x195   :  { %v176_v45 = vadd.f32 %v580_v44, %v175_v43  ;;  %v586_v50 = vpop.eup %585 }
 0x196   :  { %v588_v52 = vpop.eup %587 }
 0x197   :  { %v177_v47 = vadd.f32 %v582_v46, %v176_v45 }
 0x199   :  { %v178_v49 = vadd.f32 %v584_v48, %v177_v47 }
 0x19b   :  { %v179_v51 = vadd.f32 %v586_v50, %v178_v49 }
 0x19d   :  { %v180_v53 = vadd.f32 %v588_v52, %v179_v51 }
 0x19f   :  { %589 = vrcp.f32 %v180_v53 }
 0x1ac   :  { %v590_v54 = vpop.eup %589 }
 0x1ad   :  { %v182_v55 = vmul.f32 %v590_v54, %v574_v39  ;;  %v183_v56 = vmul.f32 %v590_v54, %v576_v40  ;;  %v184_v57 = vmul.f32 %v590_v54, %v578_v42  ;;  %v185_v58 = vmul.f32 %v590_v54, %v580_v44 }
 0x1ae   :  { %v186_v61 = vmul.f32 %v590_v54, %v582_v46  ;;  %v187_v1 = vmul.f32 %v590_v54, %v584_v48  ;;  %v188_v4 = vmul.f32 %v590_v54, %v586_v50  ;;  %v189_v7 = vmul.f32 %v590_v54, %v588_v52 }
 0x1af   :  { %v190_v59 = vmul.f32 %v182_v55, %v708_v19  ;;  %v191_v60 = vmul.f32 %v183_v56, %v720_v25  ;;  %v192_v62 = vmul.f32 %v184_v57, %v703_v18  ;;  %v193_v2 = vmul.f32 %v185_v58, %v739_v32 }
 0x1b0   :  { %v194_v5 = vmul.f32 %v186_v61, %v715_v24  ;;  %v195_v8 = vmul.f32 %v187_v1, %v732_v29  ;;  %v196_v19 = vmul.f32 %v188_v4, %v727_v28  ;;  %v197_v25 = vmul.f32 %v189_v7, %v693_v17  ;;  %v413_v24 = vld [vmem:[%s886_s3] ss:$0 sm:$0xff] }
 0x1b1   :  { %v198_v63 = vadd.f32 %v191_v60, %v190_v59 }
 0x1b3   :  { %v199_v3 = vadd.f32 %v198_v63, %v192_v62 }
 0x1b5   :  { %v200_v6 = vadd.f32 %v199_v3, %v193_v2 }
 0x1b7   :  { %v201_v9 = vadd.f32 %v200_v6, %v194_v5 }
 0x1b9   :  { %v202_v10 = vadd.f32 %v201_v9, %v195_v8 }
 0x1bb   :  { %v203_v11 = vadd.f32 %v202_v10, %v196_v19 }
 0x1bd   :  { %v204_v18 = vadd.f32 %v203_v11, %v197_v25 }
 0x1bf   :  { %534 = vmatmul.mubr.f32.vlgmr.msra.gmra.mxu1 %v204_v18 }
 0x27f   :  { %v304_v32 = vpop.f32.mrf.mxu1 }
 0x280   :  { %v375_v14 = vadd.f32 %v374_v12, %v304_v32 }
 0x281   :  { %v535_v15 = vpop.f32.mrf.mxu1 }
 0x282   :  { %v385_v16 = vadd.f32 %v413_v24, %v375_v14 }
 0x284   :  { %v414_v29 = vmul.f32 -1.442695, %v385_v16 }
 0x286   :  { %591 = vpow2.f32 %v414_v29 }
 0x293   :  { %v592_v20 = vpop.eup %591 }
 0x294   :  { %v389_v28 = vadd.f32 1.0, %v592_v20 }
 0x296   :  { %593 = vrcp.f32 %v389_v28 }
 0x2a3   :  { %v594_v21 = vpop.eup %593 }
 0x2a4   :  { %392 = vst [vmem:[%s887_s4] sm:$0xff] %v594_v21 }

// kernel: dip_g_forward.4
= control target key start
LH: loop header
LB: loop body
LE: loop exit
PB: predicated region body
PF: predicated region fallthrough
CT: control target
= control target key end

     0   :  { %v3841_v3 = vmov 0.0   ;;  %vm2536_vm0 = vmmov 0   ;;  %s3834_s1 = inlined_call_operand.vmem [shape: f32[128,384], index: 1, kind: input, shape index: {}]   ;;  %s3835_s0 = inlined_call_operand.vmem [shape: f32[8,8,384], index: 0, kind: input, shape index: {}]   ;;  %s3836_s2 = inlined_call_operand.vmem [shape: f32[1,128], index: 2, kind: input, shape index: {}]   ;;  %s3837_s5 = inlined_call_operand.vmem [shape: f32[8,8,128], index: 5, kind: output, shape index: {0}]   ;;  %s3838_s3 = inlined_call_operand.vmem [shape: f32[128,128], index: 3, kind: input, shape index: {}]   ;;  %s3839_s4 = inlined_call_operand.vmem [shape: f32[1,128], index: 4, kind: input, shape index: {}]   ;;  %s3840_s6 = inlined_call_operand.vmem [shape: f32[8,8,128], index: 6, kind: output, shape index: {1}]  }
   0x1   :  { %v2575_v0 = vld [vmem:[%s3834_s1 + $0x170] sm:$0xff]  ;;  %v2580_v1 = vld [vmem:[%s3834_s1 + $0x168] sm:$0xff]  ;;  %v2585_v2 = vld [vmem:[%s3834_s1 + $0x158] sm:$0xff]  ;;  %144 = vmatprep.mubr.f32.mxu1 %v3841_v3  ;;  %366 = vmatprep.mubr.f32.mxu0 %v3841_v3 }
   0x2   :  { %80 = vmatprep.subr.mxu1 %v2575_v0  ;;  %v2593_v4 = vld [vmem:[%s3834_s1 + $0x150] sm:$0xff]  ;;  %302 = vmatprep.subr.mxu0 %v2575_v0  ;;  %v2600_v5 = vld [vmem:[%s3834_s1 + $0x140] sm:$0xff]  ;;  %v2607_v6 = vld [vmem:[%s3834_s1 + $0x138] sm:$0xff] }
   0x3   :  { %81 = vmatpush1.msra.mxu1 %v2580_v1  ;;  %303 = vmatpush1.msra.mxu0 %v2580_v1  ;;  %v2614_v7 = vld [vmem:[%s3834_s1 + $0x128] sm:$0xff]  ;;  %v2621_v8 = vld [vmem:[%s3834_s1 + $0x120] sm:$0xff]  ;;  %v2628_v9 = vld [vmem:[%s3834_s1 + $0x110] sm:$0xff] }
   0x4   :  { %82 = vmatprep.subr.mxu1 %v2585_v2  ;;  %304 = vmatprep.subr.mxu0 %v2585_v2  ;;  %v2635_v10 = vld [vmem:[%s3834_s1 + $0x108] sm:$0xff]  ;;  %v2642_v11 = vld [vmem:[%s3834_s1 + $0xf8] sm:$0xff]  ;;  %v2649_v12 = vld [vmem:[%s3834_s1 + $0xf0] sm:$0xff] }
   0x5   :  { %83 = vmatpush1.msra.mxu1 %v2593_v4  ;;  %305 = vmatpush1.msra.mxu0 %v2593_v4  ;;  %v2656_v13 = vld [vmem:[%s3834_s1 + $0xe0] sm:$0xff]  ;;  %v2663_v14 = vld [vmem:[%s3834_s1 + $0xd8] sm:$0xff]  ;;  %v2670_v15 = vld [vmem:[%s3834_s1 + $0xc8] sm:$0xff] }
   0x6   :  { %84 = vmatprep.subr.mxu1 %v2600_v5  ;;  %306 = vmatprep.subr.mxu0 %v2600_v5  ;;  %v2677_v16 = vld [vmem:[%s3834_s1 + $0xc0] sm:$0xff]  ;;  %v2684_v17 = vld [vmem:[%s3834_s1 + $0xb0] sm:$0xff]  ;;  %v2691_v18 = vld [vmem:[%s3834_s1 + $0xa8] sm:$0xff] }
   0x7   :  { %85 = vmatpush1.msra.mxu1 %v2607_v6  ;;  %307 = vmatpush1.msra.mxu0 %v2607_v6  ;;  %v2698_v19 = vld [vmem:[%s3834_s1 + $0x98] sm:$0xff]  ;;  %v2705_v20 = vld [vmem:[%s3834_s1 + $0x90] sm:$0xff]  ;;  %v2712_v21 = vld [vmem:[%s3834_s1 + $0x80] sm:$0xff] }
   0x8   :  { %86 = vmatprep.subr.mxu1 %v2614_v7  ;;  %308 = vmatprep.subr.mxu0 %v2614_v7  ;;  %v2719_v22 = vld [vmem:[%s3834_s1 + $0x78] sm:$0xff]  ;;  %v2726_v23 = vld [vmem:[%s3834_s1 + $0x68] sm:$0xff]  ;;  %v2733_v24 = vld [vmem:[%s3834_s1 + $0x60] sm:$0xff] }
   0x9   :  { %87 = vmatpush1.msra.mxu1 %v2621_v8  ;;  %309 = vmatpush1.msra.mxu0 %v2621_v8  ;;  %v2740_v25 = vld [vmem:[%s3834_s1 + $0x50] sm:$0xff]  ;;  %v2747_v26 = vld [vmem:[%s3834_s1 + $0x48] sm:$0xff]  ;;  %v2754_v27 = vld [vmem:[%s3834_s1 + $0x38] sm:$0xff] }
   0xa   :  { %88 = vmatprep.subr.mxu1 %v2628_v9  ;;  %310 = vmatprep.subr.mxu0 %v2628_v9  ;;  %v2761_v28 = vld [vmem:[%s3834_s1 + $0x30] sm:$0xff]  ;;  %v2768_v29 = vld [vmem:[%s3834_s1 + $0x20] sm:$0xff]  ;;  %v2775_v30 = vld [vmem:[%s3834_s1 + $0x18] sm:$0xff] }
   0xb   :  { %89 = vmatpush1.msra.mxu1 %v2635_v10  ;;  %311 = vmatpush1.msra.mxu0 %v2635_v10  ;;  %v2782_v31 = vld [vmem:[%s3834_s1 + $0x8] sm:$0xff]  ;;  %v2789_v32 = vld [vmem:[%s3834_s1] sm:$0xff]  ;;  %v2798_v33 = vld [vmem:[%s3834_s1 + $0x178] sm:$0xff] }
   0xc   :  { %90 = vmatprep.subr.mxu1 %v2642_v11  ;;  %312 = vmatprep.subr.mxu0 %v2642_v11  ;;  %3850 = vst [vmem:[#allocation3_spill] sm:$0xff] %v2789_v32  ;;  %v2808_v34 = vld [vmem:[%s3834_s1 + $0x160] sm:$0xff]  ;;  %v2817_v35 = vld [vmem:[%s3834_s1 + $0x148] sm:$0xff]  ;;  %v2825_v36 = vld [vmem:[%s3834_s1 + $0x130] sm:$0xff] }
   0xd   :  { %91 = vmatpush1.msra.mxu1 %v2649_v12  ;;  %313 = vmatpush1.msra.mxu0 %v2649_v12  ;;  %v2832_v37 = vld [vmem:[%s3834_s1 + $0x118] sm:$0xff]  ;;  %v2839_v38 = vld [vmem:[%s3834_s1 + $0x100] sm:$0xff]  ;;  %v2846_v39 = vld [vmem:[%s3834_s1 + $0xe8] sm:$0xff] }
   0xe   :  { %92 = vmatprep.subr.mxu1 %v2656_v13  ;;  %314 = vmatprep.subr.mxu0 %v2656_v13  ;;  %v2853_v40 = vld [vmem:[%s3834_s1 + $0xd0] sm:$0xff]  ;;  %v2860_v41 = vld [vmem:[%s3834_s1 + $0xb8] sm:$0xff]  ;;  %v2867_v42 = vld [vmem:[%s3834_s1 + $0xa0] sm:$0xff] }
   0xf   :  { %93 = vmatpush1.msra.mxu1 %v2663_v14  ;;  %315 = vmatpush1.msra.mxu0 %v2663_v14  ;;  %v2874_v43 = vld [vmem:[%s3834_s1 + $0x88] sm:$0xff]  ;;  %v2881_v44 = vld [vmem:[%s3834_s1 + $0x70] sm:$0xff]  ;;  %v2888_v45 = vld [vmem:[%s3834_s1 + $0x58] sm:$0xff] }
  0x10   :  { %94 = vmatprep.subr.mxu1 %v2670_v15  ;;  %316 = vmatprep.subr.mxu0 %v2670_v15  ;;  %v2895_v46 = vld [vmem:[%s3834_s1 + $0x40] sm:$0xff]  ;;  %v2902_v47 = vld [vmem:[%s3834_s1 + $0x28] sm:$0xff]  ;;  %v2909_v48 = vld [vmem:[%s3834_s1 + $0x10] sm:$0xff] }
  0x11   :  { %95 = vmatpush1.msra.mxu1 %v2677_v16  ;;  %317 = vmatpush1.msra.mxu0 %v2677_v16  ;;  %3851 = vst [vmem:[#allocation4_spill] sm:$0xff] %v2909_v48  ;;  %v29_v49 = vld [vmem:[%s3835_s0] sm:$0xff]  ;;  %v30_v53 = vld [vmem:[%s3835_s0 + $0x8] sm:$0xff] }
  0x12   :  { %96 = vmatprep.subr.mxu1 %v2684_v17  ;;  %318 = vmatprep.subr.mxu0 %v2684_v17  ;;  %v2959_v60 = vld [vmem:[%s3836_s2] ss:$0 sm:$0xff] }
  0x13   :  { %97 = vmatpush1.msra.mxu1 %v2691_v18  ;;  %319 = vmatpush1.msra.mxu0 %v2691_v18 }
  0x14   :  { %98 = vmatprep.subr.mxu1 %v2698_v19  ;;  %320 = vmatprep.subr.mxu0 %v2698_v19 }
  0x15   :  { %99 = vmatpush1.msra.mxu1 %v2705_v20  ;;  %321 = vmatpush1.msra.mxu0 %v2705_v20 }
  0x16   :  { %100 = vmatprep.subr.mxu1 %v2712_v21  ;;  %322 = vmatprep.subr.mxu0 %v2712_v21 }
  0x17   :  { %101 = vmatpush1.msra.mxu1 %v2719_v22  ;;  %323 = vmatpush1.msra.mxu0 %v2719_v22 }
  0x18   :  { %102 = vmatprep.subr.mxu1 %v2726_v23  ;;  %324 = vmatprep.subr.mxu0 %v2726_v23 }
  0x19   :  { %103 = vmatpush1.msra.mxu1 %v2733_v24  ;;  %325 = vmatpush1.msra.mxu0 %v2733_v24 }
  0x1a   :  { %104 = vmatprep.subr.mxu1 %v2740_v25  ;;  %326 = vmatprep.subr.mxu0 %v2740_v25 }
  0x1b   :  { %105 = vmatpush1.msra.mxu1 %v2747_v26  ;;  %327 = vmatpush1.msra.mxu0 %v2747_v26 }
  0x1c   :  { %106 = vmatprep.subr.mxu1 %v2754_v27  ;;  %328 = vmatprep.subr.mxu0 %v2754_v27 }
  0x1d   :  { %107 = vmatpush1.msra.mxu1 %v2761_v28  ;;  %329 = vmatpush1.msra.mxu0 %v2761_v28 }
  0x1e   :  { %108 = vmatprep.subr.mxu1 %v2768_v29  ;;  %330 = vmatprep.subr.mxu0 %v2768_v29 }
  0x1f   :  { %109 = vmatpush1.msra.mxu1 %v2775_v30  ;;  %331 = vmatpush1.msra.mxu0 %v2775_v30 }
  0x20   :  { %110 = vmatprep.subr.mxu1 %v2782_v31  ;;  %332 = vmatprep.subr.mxu0 %v2782_v31 }
  0x21   :  { %111 = vmatpush1.msra.mxu1 %v2789_v32  ;;  %333 = vmatpush1.msra.mxu0 %v2789_v32 }
  0x22   :  { %145 = vmatmul.mubr.f32.vlgmr.msra.gmra.mxu1 %v3841_v3  ;;  %2128 = vmatprep.subr.mxu1 %v3841_v3 }
  0x23   :  { %2129 = vmatpush3.msra.mxu1 %v2798_v33  ;;  %2160 = vmatprep.mubr.msk.f32.mxu1 %vm2536_vm0, %v3841_v3 }
  0x24   :  { %2130 = vmatprep.subr.mxu1 %v3841_v3  ;;  %519 = vmatprep.subr.mxu0 %v2575_v0 }
  0x25   :  { %2131 = vmatpush3.msra.mxu1 %v2808_v34 }
  0x26   :  { %2132 = vmatprep.subr.mxu1 %v3841_v3 }
  0x27   :  { %2133 = vmatpush3.msra.mxu1 %v2817_v35 }
  0x28   :  { %2134 = vmatprep.subr.mxu1 %v3841_v3 }
  0x29   :  { %2135 = vmatpush3.msra.mxu1 %v2825_v36 }
  0x2a   :  { %2136 = vmatprep.subr.mxu1 %v3841_v3 }
  0x2b   :  { %2137 = vmatpush3.msra.mxu1 %v2832_v37 }
  0x2c   :  { %2138 = vmatprep.subr.mxu1 %v3841_v3 }
  0x2d   :  { %2139 = vmatpush3.msra.mxu1 %v2839_v38 }
  0x2e   :  { %2140 = vmatprep.subr.mxu1 %v3841_v3 }
  0x2f   :  { %2141 = vmatpush3.msra.mxu1 %v2846_v39 }
  0x30   :  { %2142 = vmatprep.subr.mxu1 %v3841_v3 }
  0x31   :  { %2143 = vmatpush3.msra.mxu1 %v2853_v40 }
  0x32   :  { %2144 = vmatprep.subr.mxu1 %v3841_v3 }
  0x33   :  { %2145 = vmatpush3.msra.mxu1 %v2860_v41 }
  0x34   :  { %2146 = vmatprep.subr.mxu1 %v3841_v3 }
  0x35   :  { %2147 = vmatpush3.msra.mxu1 %v2867_v42 }
  0x36   :  { %2148 = vmatprep.subr.mxu1 %v3841_v3 }
  0x37   :  { %2149 = vmatpush3.msra.mxu1 %v2874_v43 }
  0x38   :  { %2150 = vmatprep.subr.mxu1 %v3841_v3 }
  0x39   :  { %2151 = vmatpush3.msra.mxu1 %v2881_v44 }
  0x3a   :  { %2152 = vmatprep.subr.mxu1 %v3841_v3 }
  0x3b   :  { %2153 = vmatpush3.msra.mxu1 %v2888_v45 }
  0x3c   :  { %2154 = vmatprep.subr.mxu1 %v3841_v3 }
  0x3d   :  { %2155 = vmatpush3.msra.mxu1 %v2895_v46 }
  0x3e   :  { %2156 = vmatprep.subr.mxu1 %v3841_v3 }
  0x3f   :  { %2157 = vmatpush3.msra.mxu1 %v2902_v47 }
  0x40   :  { %2158 = vmatprep.subr.mxu1 %v3841_v3 }
  0x41   :  { %2159 = vmatpush3.msra.mxu1 %v2909_v48 }
  0x42   :  { %2161 = vmatmul.mubr.f32.vlgmr.msra.gmra.mxu1 %v3841_v3  ;;  %2163 = vmatprep.subr.mxu1 %v3841_v3 }
  0x43   :  { %2164 = vmatpush3.msra.mxu1 %v2798_v33  ;;  %2195 = vmatprep.mubr.msk.f32.mxu1 %vm2536_vm0, %v3841_v3 }
  0x44   :  { %2165 = vmatprep.subr.mxu1 %v3841_v3 }
  0x45   :  { %2166 = vmatpush3.msra.mxu1 %v2808_v34 }
  0x46   :  { %2167 = vmatprep.subr.mxu1 %v3841_v3 }
  0x47   :  { %2168 = vmatpush3.msra.mxu1 %v2817_v35 }
  0x48   :  { %2169 = vmatprep.subr.mxu1 %v3841_v3 }
  0x49   :  { %2170 = vmatpush3.msra.mxu1 %v2825_v36 }
  0x4a   :  { %2171 = vmatprep.subr.mxu1 %v3841_v3 }
  0x4b   :  { %2172 = vmatpush3.msra.mxu1 %v2832_v37 }
  0x4c   :  { %2173 = vmatprep.subr.mxu1 %v3841_v3 }
  0x4d   :  { %2174 = vmatpush3.msra.mxu1 %v2839_v38 }
  0x4e   :  { %2175 = vmatprep.subr.mxu1 %v3841_v3 }
  0x4f   :  { %2176 = vmatpush3.msra.mxu1 %v2846_v39 }
  0x50   :  { %2177 = vmatprep.subr.mxu1 %v3841_v3 }
  0x51   :  { %2178 = vmatpush3.msra.mxu1 %v2853_v40 }
  0x52   :  { %2179 = vmatprep.subr.mxu1 %v3841_v3 }
  0x53   :  { %2180 = vmatpush3.msra.mxu1 %v2860_v41 }
  0x54   :  { %2181 = vmatprep.subr.mxu1 %v3841_v3 }
  0x55   :  { %2182 = vmatpush3.msra.mxu1 %v2867_v42 }
  0x56   :  { %2183 = vmatprep.subr.mxu1 %v3841_v3 }
  0x57   :  { %2184 = vmatpush3.msra.mxu1 %v2874_v43 }
  0x58   :  { %2185 = vmatprep.subr.mxu1 %v3841_v3 }
  0x59   :  { %2186 = vmatpush3.msra.mxu1 %v2881_v44 }
  0x5a   :  { %2187 = vmatprep.subr.mxu1 %v3841_v3 }
  0x5b   :  { %2188 = vmatpush3.msra.mxu1 %v2888_v45 }
  0x5c   :  { %2189 = vmatprep.subr.mxu1 %v3841_v3 }
  0x5d   :  { %2190 = vmatpush3.msra.mxu1 %v2895_v46 }
  0x5e   :  { %2191 = vmatprep.subr.mxu1 %v3841_v3 }
  0x5f   :  { %2192 = vmatpush3.msra.mxu1 %v2902_v47 }
  0x60   :  { %2193 = vmatprep.subr.mxu1 %v3841_v3 }
  0x61   :  { %2194 = vmatpush3.msra.mxu1 %v2909_v48 }
  0x62   :  { %2198 = vmatprep.subr.mxu1 %v3841_v3 }
  0xe2   :  { %v146_v50 = vpop.f32.mrf.mxu1 }
  0xe3   :  { %v221_v51 = vadd.f32 %v146_v50, %v29_v49  ;;  %v31_v50 = vld [vmem:[%s3835_s0 + $0x10] sm:$0xff] }
  0xe4   :  { %v148_v54 = vpop.f32.mrf.mxu1 }
  0xe5   :  { %v1922_v52 = vmul.f32 -1.442695, %v221_v51  ;;  %v228_v55 = vadd.f32 %v148_v54, %v30_v53 }
  0xe7   :  { %2454 = vpow2.f32 %v1922_v52  ;;  %v1923_v56 = vmul.f32 -1.442695, %v228_v55 }
  0xe9   :  { %2456 = vpow2.f32 %v1923_v56 }
  0xf4   :  { %v2455_v57 = vpop.eup %2454 }
  0xf5   :  { %v225_v58 = vadd.f32 1.0, %v2455_v57 }
  0xf6   :  { %v2457_v59 = vpop.eup %2456 }
  0xf7   :  { %2458 = vrcp.f32 %v225_v58  ;;  %v232_v61 = vadd.f32 1.0, %v2457_v59  ;;  %v3852_v59 = vmov 0.0  }
  0xf9   :  { %2460 = vrcp.f32 %v232_v61  ;;  %v1925_v61 = vld [vmem:[%s3835_s0 + $0x18] sm:$0xff] }
 0x102   :  { %v217_v62 = vpop.f32.mrf.mxu1 }
 0x103   :  { %v241_v63 = vadd.f32 %v2959_v60, %v217_v62 }
 0x104   :  { %v2459_v49 = vpop.eup %2458  ;;  %v2162_v51 = vpop.f32.mrf.mxu1 }
 0x105   :  { %v242_v52 = vmul.f32 %v2459_v49, %v241_v63 }
 0x106   :  { %v2461_v54 = vpop.eup %2460 }
 0x107   :  { %v243_v53 = vadd.f32 %v242_v52, %v31_v50  ;;  %v245_v55 = vsub.f32 1.0, %v2461_v54  ;;  %v247_v58 = vmul.f32 0.0, %v2461_v54  ;;  %v1926_v52 = vld [vmem:[%s3835_s0 + $0x20] sm:$0xff] }
 0x109   :  { %2462 = vtanh.f32 %v243_v53 }
 0x116   :  { %v2463_v56 = vpop.eup %2462 }
 0x117   :  { %v246_v57 = vmul.f32 %v2463_v56, %v245_v55 }
 0x119   :  { %v2965_v3 = vadd.f32 %v247_v58, %v246_v57 }
 0x11b   :  { %249 = vst [vmem:[%s3837_s5] sm:$0xff] %v2965_v3  ;;  %367 = vmatmul.mubr.f32.vlgmr.msra.gmra.mxu0 %v2965_v3  ;;  %2196 = vmatmul.mubr.f32.vlgmr.msra.gmra.mxu1 %v2965_v3 }
 0x11c   :  { %520 = vmatpush1.msra.mxu0 %v2580_v1  ;;  %2199 = vmatpush3.msra.mxu1 %v2798_v33 }
 0x11d   :  { %521 = vmatprep.subr.mxu0 %v2585_v2  ;;  %2200 = vmatprep.subr.mxu1 %v3852_v59 }
 0x11e   :  { %522 = vmatpush1.msra.mxu0 %v2593_v4  ;;  %2201 = vmatpush3.msra.mxu1 %v2808_v34 }
 0x11f   :  { %523 = vmatprep.subr.mxu0 %v2600_v5  ;;  %2202 = vmatprep.subr.mxu1 %v3852_v59 }
 0x120   :  { %524 = vmatpush1.msra.mxu0 %v2607_v6  ;;  %2203 = vmatpush3.msra.mxu1 %v2817_v35 }
 0x121   :  { %525 = vmatprep.subr.mxu0 %v2614_v7  ;;  %2204 = vmatprep.subr.mxu1 %v3852_v59 }
 0x122   :  { %526 = vmatpush1.msra.mxu0 %v2621_v8  ;;  %2205 = vmatpush3.msra.mxu1 %v2825_v36 }
 0x123   :  { %527 = vmatprep.subr.mxu0 %v2628_v9  ;;  %2206 = vmatprep.subr.mxu1 %v3852_v59 }
 0x124   :  { %528 = vmatpush1.msra.mxu0 %v2635_v10  ;;  %2207 = vmatpush3.msra.mxu1 %v2832_v37 }
 0x125   :  { %529 = vmatprep.subr.mxu0 %v2642_v11  ;;  %2208 = vmatprep.subr.mxu1 %v3852_v59 }
 0x126   :  { %530 = vmatpush1.msra.mxu0 %v2649_v12  ;;  %2209 = vmatpush3.msra.mxu1 %v2839_v38 }
 0x127   :  { %531 = vmatprep.subr.mxu0 %v2656_v13  ;;  %2210 = vmatprep.subr.mxu1 %v3852_v59 }
 0x128   :  { %532 = vmatpush1.msra.mxu0 %v2663_v14  ;;  %2211 = vmatpush3.msra.mxu1 %v2846_v39 }
 0x129   :  { %533 = vmatprep.subr.mxu0 %v2670_v15  ;;  %2212 = vmatprep.subr.mxu1 %v3852_v59 }
 0x12a   :  { %534 = vmatpush1.msra.mxu0 %v2677_v16  ;;  %2213 = vmatpush3.msra.mxu1 %v2853_v40 }
 0x12b   :  { %535 = vmatprep.subr.mxu0 %v2684_v17  ;;  %2214 = vmatprep.subr.mxu1 %v3852_v59 }
 0x12c   :  { %536 = vmatpush1.msra.mxu0 %v2691_v18  ;;  %2215 = vmatpush3.msra.mxu1 %v2860_v41 }
 0x12d   :  { %537 = vmatprep.subr.mxu0 %v2698_v19  ;;  %2216 = vmatprep.subr.mxu1 %v3852_v59 }
 0x12e   :  { %538 = vmatpush1.msra.mxu0 %v2705_v20  ;;  %2217 = vmatpush3.msra.mxu1 %v2867_v42 }
 0x12f   :  { %539 = vmatprep.subr.mxu0 %v2712_v21  ;;  %2218 = vmatprep.subr.mxu1 %v3852_v59 }
 0x130   :  { %540 = vmatpush1.msra.mxu0 %v2719_v22  ;;  %2219 = vmatpush3.msra.mxu1 %v2874_v43 }
 0x131   :  { %541 = vmatprep.subr.mxu0 %v2726_v23  ;;  %2220 = vmatprep.subr.mxu1 %v3852_v59 }
 0x132   :  { %542 = vmatpush1.msra.mxu0 %v2733_v24  ;;  %2221 = vmatpush3.msra.mxu1 %v2881_v44 }
 0x133   :  { %543 = vmatprep.subr.mxu0 %v2740_v25  ;;  %2222 = vmatprep.subr.mxu1 %v3852_v59 }
 0x134   :  { %544 = vmatpush1.msra.mxu0 %v2747_v26  ;;  %2223 = vmatpush3.msra.mxu1 %v2888_v45 }
 0x135   :  { %545 = vmatprep.subr.mxu0 %v2754_v27  ;;  %2224 = vmatprep.subr.mxu1 %v3852_v59 }
 0x136   :  { %546 = vmatpush1.msra.mxu0 %v2761_v28  ;;  %2225 = vmatpush3.msra.mxu1 %v2895_v46 }
 0x137   :  { %547 = vmatprep.subr.mxu0 %v2768_v29  ;;  %2226 = vmatprep.subr.mxu1 %v3852_v59 }
 0x138   :  { %548 = vmatpush1.msra.mxu0 %v2775_v30  ;;  %2227 = vmatpush3.msra.mxu1 %v2902_v47 }
 0x139   :  { %549 = vmatprep.subr.mxu0 %v2782_v31  ;;  %2228 = vmatprep.subr.mxu1 %v3852_v59 }
 0x13a   :  { %550 = vmatpush1.msra.mxu0 %v2789_v32  ;;  %583 = vmatprep.mubr.f32.mxu0 %v3852_v59 }
 0x13b   :  { %2229 = vmatpush3.msra.mxu1 %v2909_v48  ;;  %2230 = vmatprep.mubr.msk.f32.mxu1 %vm2536_vm0, %v3852_v59 }
 0x13c   :  { %736 = vmatprep.subr.mxu0 %v2575_v0  ;;  %2233 = vmatprep.subr.mxu1 %v3852_v59 }
 0x1db   :  { %v368_v62 = vpop.f32.mrf.mxu0  ;;  %v439_v63 = vpop.f32.mrf.mxu1 }
 0x1dc   :  { %v443_v49 = vadd.f32 %v1925_v61, %v368_v62  ;;  %v457_v48 = vadd.f32 %v2959_v60, %v439_v63  ;;  %v1927_v61 = vld [vmem:[%s3835_s0 + $0x28] sm:$0xff]  ;;  %v3284_v63 = vld [vmem:[%s3834_s1 + $0xd0] sm:$0xff] }
 0x1dd   :  { %v2197_v50 = vpop.f32.mrf.mxu1  ;;  %v370_v53 = vpop.f32.mrf.mxu0 }
 0x1de   :  { %v1928_v51 = vmul.f32 -1.442695, %v443_v49  ;;  %v450_v54 = vadd.f32 %v1926_v52, %v370_v53 }
 0x1e0   :  { %2464 = vpow2.f32 %v1928_v51  ;;  %v1929_v55 = vmul.f32 -1.442695, %v450_v54 }
 0x1e2   :  { %2466 = vpow2.f32 %v1929_v55 }
 0x1ed   :  { %v2465_v0 = vpop.eup %2464 }
 0x1ee   :  { %v447_v56 = vadd.f32 1.0, %v2465_v0  ;;  %v3289_v0 = vld [vmem:[%s3834_s1 + $0xb0] sm:$0xff] }
 0x1ef   :  { %v2467_v57 = vpop.eup %2466 }
 0x1f0   :  { %2468 = vrcp.f32 %v447_v56  ;;  %v454_v58 = vadd.f32 1.0, %v2467_v57  ;;  %v3296_v56 = vld [vmem:[%s3834_s1 + $0xa8] sm:$0xff]  ;;  %v3301_v57 = vld [vmem:[%s3834_s1 + $0xb8] sm:$0xff] }
 0x1f2   :  { %2470 = vrcp.f32 %v454_v58  ;;  %v3306_v58 = vld [vmem:[%s3834_s1 + $0x98] sm:$0xff] }
 0x1fd   :  { %v2469_v32 = vpop.eup %2468 }
 0x1fe   :  { %v458_v62 = vmul.f32 %v2469_v32, %v457_v48  ;;  %v3178_v32 = vld [vmem:[%s3834_s1 + $0x140] sm:$0xff] }
 0x1ff   :  { %v2471_v50 = vpop.eup %2470  ;;  %v3279_v48 = vld [vmem:[%s3834_s1 + $0xc0] sm:$0xff] }
 0x200   :  { %v459_v49 = vadd.f32 %v1927_v61, %v458_v62  ;;  %v461_v51 = vsub.f32 1.0, %v2471_v50  ;;  %v463_v54 = vmul.f32 %v2471_v50, %v2965_v3  ;;  %v1931_v3 = vld [vmem:[%s3835_s0 + $0x30] sm:$0xff]  ;;  %v3318_v62 = vld [vmem:[%s3834_s1 + $0xa0] sm:$0xff]  ;;  %v3332_v50 = vld [vmem:[%s3834_s1 + $0x78] sm:$0xff] }
 0x201   :  { %v3313_v61 = vld [vmem:[%s3834_s1 + $0x90] sm:$0xff] }
 0x202   :  { %2472 = vtanh.f32 %v459_v49  ;;  %v3325_v49 = vld [vmem:[%s3834_s1 + $0x80] sm:$0xff] }
 0x20f   :  { %v2473_v52 = vpop.eup %2472 }
 0x210   :  { %v462_v53 = vmul.f32 %v2473_v52, %v461_v51  ;;  %v3337_v51 = vld [vmem:[%s3834_s1 + $0x88] sm:$0xff] }
 0x211   :  { %v3344_v52 = vld [vmem:[%s3834_s1 + $0x68] sm:$0xff] }
 0x212   :  { %v3051_v55 = vadd.f32 %v463_v54, %v462_v53  ;;  %v3351_v53 = vld [vmem:[%s3834_s1 + $0x60] sm:$0xff]  ;;  %v3356_v54 = vld [vmem:[%s3834_s1 + $0x70] sm:$0xff] }
 0x214   :  { %1930 = vst [vmem:[%s3837_s5 + $0x8] sm:$0xff] %v3051_v55  ;;  %584 = vmatmul.mubr.f32.vlgmr.msra.gmra.mxu0 %v3051_v55  ;;  %2231 = vmatmul.mubr.f32.vlgmr.msra.gmra.mxu1 %v3051_v55 }
 0x215   :  { %737 = vmatpush1.msra.mxu0 %v2580_v1  ;;  %2234 = vmatpush3.msra.mxu1 %v2798_v33  ;;  %v3853_v1 = vld [vmem:[#allocation3_spill] sm:$0xff] }
 0x216   :  { %738 = vmatprep.subr.mxu0 %v2585_v2  ;;  %2235 = vmatprep.subr.mxu1 %v3852_v59  ;;  %v3854_v2 = vld [vmem:[#allocation4_spill] sm:$0xff] }
 0x217   :  { %739 = vmatpush1.msra.mxu0 %v2593_v4  ;;  %2236 = vmatpush3.msra.mxu1 %v2808_v34 }
 0x218   :  { %740 = vmatprep.subr.mxu0 %v2600_v5  ;;  %2237 = vmatprep.subr.mxu1 %v3852_v59 }
 0x219   :  { %741 = vmatpush1.msra.mxu0 %v2607_v6  ;;  %2238 = vmatpush3.msra.mxu1 %v2817_v35  ;;  %v3196_v35 = vld [vmem:[%s3834_s1 + $0x128] sm:$0xff] }
 0x21a   :  { %742 = vmatprep.subr.mxu0 %v2614_v7  ;;  %2239 = vmatprep.subr.mxu1 %v3852_v59 }
 0x21b   :  { %743 = vmatpush1.msra.mxu0 %v2621_v8  ;;  %2240 = vmatpush3.msra.mxu1 %v2825_v36  ;;  %v3203_v36 = vld [vmem:[%s3834_s1 + $0x120] sm:$0xff] }
 0x21c   :  { %744 = vmatprep.subr.mxu0 %v2628_v9  ;;  %2241 = vmatprep.subr.mxu1 %v3852_v59  ;;  %v1932_v9 = vld [vmem:[%s3835_s0 + $0x38] sm:$0xff] }
 0x21d   :  { %745 = vmatpush1.msra.mxu0 %v2635_v10  ;;  %2242 = vmatpush3.msra.mxu1 %v2832_v37  ;;  %v3208_v37 = vld [vmem:[%s3834_s1 + $0x130] sm:$0xff] }
 0x21e   :  { %746 = vmatprep.subr.mxu0 %v2642_v11  ;;  %2243 = vmatprep.subr.mxu1 %v3852_v59 }
 0x21f   :  { %747 = vmatpush1.msra.mxu0 %v2649_v12  ;;  %2244 = vmatpush3.msra.mxu1 %v2839_v38  ;;  %v3215_v38 = vld [vmem:[%s3834_s1 + $0x110] sm:$0xff] }
 0x220   :  { %748 = vmatprep.subr.mxu0 %v2656_v13  ;;  %2245 = vmatprep.subr.mxu1 %v3852_v59 }
 0x221   :  { %749 = vmatpush1.msra.mxu0 %v2663_v14  ;;  %2246 = vmatpush3.msra.mxu1 %v2846_v39  ;;  %v3222_v39 = vld [vmem:[%s3834_s1 + $0x108] sm:$0xff] }
 0x222   :  { %750 = vmatprep.subr.mxu0 %v2670_v15  ;;  %2247 = vmatprep.subr.mxu1 %v3852_v59 }
 0x223   :  { %751 = vmatpush1.msra.mxu0 %v2677_v16  ;;  %2248 = vmatpush3.msra.mxu1 %v2853_v40  ;;  %v3227_v40 = vld [vmem:[%s3834_s1 + $0x118] sm:$0xff] }
 0x224   :  { %752 = vmatprep.subr.mxu0 %v2684_v17  ;;  %2249 = vmatprep.subr.mxu1 %v3852_v59 }
 0x225   :  { %753 = vmatpush1.msra.mxu0 %v2691_v18  ;;  %2250 = vmatpush3.msra.mxu1 %v2860_v41  ;;  %v3234_v41 = vld [vmem:[%s3834_s1 + $0xf8] sm:$0xff] }
 0x226   :  { %754 = vmatprep.subr.mxu0 %v2698_v19  ;;  %2251 = vmatprep.subr.mxu1 %v3852_v59  ;;  %v1933_v19 = vld [vmem:[%s3835_s0 + $0x40] sm:$0xff] }
 0x227   :  { %755 = vmatpush1.msra.mxu0 %v2705_v20  ;;  %2252 = vmatpush3.msra.mxu1 %v2867_v42  ;;  %v3241_v42 = vld [vmem:[%s3834_s1 + $0xf0] sm:$0xff] }
 0x228   :  { %756 = vmatprep.subr.mxu0 %v2712_v21  ;;  %2253 = vmatprep.subr.mxu1 %v3852_v59 }
 0x229   :  { %757 = vmatpush1.msra.mxu0 %v2719_v22  ;;  %2254 = vmatpush3.msra.mxu1 %v2874_v43  ;;  %v3246_v43 = vld [vmem:[%s3834_s1 + $0x100] sm:$0xff] }
 0x22a   :  { %758 = vmatprep.subr.mxu0 %v2726_v23  ;;  %2255 = vmatprep.subr.mxu1 %v3852_v59 }
 0x22b   :  { %759 = vmatpush1.msra.mxu0 %v2733_v24  ;;  %2256 = vmatpush3.msra.mxu1 %v2881_v44  ;;  %v3253_v44 = vld [vmem:[%s3834_s1 + $0xe0] sm:$0xff] }
 0x22c   :  { %760 = vmatprep.subr.mxu0 %v2740_v25  ;;  %2257 = vmatprep.subr.mxu1 %v3852_v59 }
 0x22d   :  { %761 = vmatpush1.msra.mxu0 %v2747_v26  ;;  %2258 = vmatpush3.msra.mxu1 %v2888_v45  ;;  %v3260_v45 = vld [vmem:[%s3834_s1 + $0xd8] sm:$0xff] }
 0x22e   :  { %762 = vmatprep.subr.mxu0 %v2754_v27  ;;  %2259 = vmatprep.subr.mxu1 %v3852_v59 }
 0x22f   :  { %763 = vmatpush1.msra.mxu0 %v2761_v28  ;;  %2260 = vmatpush3.msra.mxu1 %v2895_v46  ;;  %v3154_v28 = vld [vmem:[%s3834_s1 + $0x170] sm:$0xff]  ;;  %v3265_v46 = vld [vmem:[%s3834_s1 + $0xe8] sm:$0xff] }
 0x230   :  { %764 = vmatprep.subr.mxu0 %v2768_v29  ;;  %2261 = vmatprep.subr.mxu1 %v3852_v59  ;;  %3855 = vst [vmem:[#allocation3_spill] sm:$0xff] %v3154_v28  ;;  %v3160_v29 = vld [vmem:[%s3834_s1 + $0x168] sm:$0xff] }
 0x231   :  { %765 = vmatpush1.msra.mxu0 %v2775_v30  ;;  %2262 = vmatpush3.msra.mxu1 %v2902_v47  ;;  %v3166_v30 = vld [vmem:[%s3834_s1 + $0x158] sm:$0xff]  ;;  %v3272_v47 = vld [vmem:[%s3834_s1 + $0xc8] sm:$0xff] }
 0x232   :  { %766 = vmatprep.subr.mxu0 %v2782_v31  ;;  %2263 = vmatprep.subr.mxu1 %v3852_v59  ;;  %v3172_v31 = vld [vmem:[%s3834_s1 + $0x150] sm:$0xff] }
 0x233   :  { %767 = vmatpush1.msra.mxu0 %v3853_v1  ;;  %800 = vmatprep.mubr.f32.mxu0 %v3852_v59  ;;  %v3370_v1 = vld [vmem:[%s3834_s1 + $0x48] sm:$0xff] }
 0x234   :  { %2264 = vmatpush3.msra.mxu1 %v3854_v2  ;;  %2265 = vmatprep.mubr.msk.f32.mxu1 %vm2536_vm0, %v3852_v59  ;;  %v3375_v2 = vld [vmem:[%s3834_s1 + $0x58] sm:$0xff] }
 0x235   :  { %2268 = vmatprep.subr.mxu1 %v3852_v59  ;;  %953 = vmatprep.subr.mxu0 %v3154_v28 }
 0x2d4   :  { %v585_v4 = vpop.f32.mrf.mxu0  ;;  %v656_v5 = vpop.f32.mrf.mxu1 }
 0x2d5   :  { %v660_v6 = vadd.f32 %v1931_v3, %v585_v4  ;;  %v674_v17 = vadd.f32 %v2959_v60, %v656_v5  ;;  %v3382_v3 = vld [vmem:[%s3834_s1 + $0x38] sm:$0xff]  ;;  %v3389_v4 = vld [vmem:[%s3834_s1 + $0x30] sm:$0xff]  ;;  %v3394_v5 = vld [vmem:[%s3834_s1 + $0x40] sm:$0xff] }
 0x2d6   :  { %v2232_v7 = vpop.f32.mrf.mxu1  ;;  %v587_v10 = vpop.f32.mrf.mxu0 }
 0x2d7   :  { %v1934_v8 = vmul.f32 -1.442695, %v660_v6  ;;  %v667_v11 = vadd.f32 %v1932_v9, %v587_v10  ;;  %v3401_v6 = vld [vmem:[%s3834_s1 + $0x20] sm:$0xff]  ;;  %v3408_v7 = vld [vmem:[%s3834_s1 + $0x18] sm:$0xff]  ;;  %v3420_v9 = vld [vmem:[%s3834_s1 + $0x8] sm:$0xff] }
 0x2d8   :  { %v3427_v10 = vld [vmem:[%s3834_s1] sm:$0xff] }
 0x2d9   :  { %2474 = vpow2.f32 %v1934_v8  ;;  %v1935_v12 = vmul.f32 -1.442695, %v667_v11  ;;  %v3413_v8 = vld [vmem:[%s3834_s1 + $0x28] sm:$0xff]  ;;  %3856 = vst [vmem:[#allocation4_spill] sm:$0xff] %v3427_v10  ;;  %v3432_v11 = vld [vmem:[%s3834_s1 + $0x10] sm:$0xff] }
 0x2da   :  { %3857 = vst [vmem:[#allocation5_spill] sm:$0xff] %v3432_v11 }
 0x2db   :  { %2476 = vpow2.f32 %v1935_v12  ;;  %v1937_v12 = vld [vmem:[%s3835_s0 + $0x48] sm:$0xff] }
 0x2e6   :  { %v2475_v13 = vpop.eup %2474 }
 0x2e7   :  { %v664_v14 = vadd.f32 1.0, %v2475_v13 }
 0x2e8   :  { %v2477_v15 = vpop.eup %2476 }
 0x2e9   :  { %2478 = vrcp.f32 %v664_v14  ;;  %v671_v16 = vadd.f32 1.0, %v2477_v15 }
 0x2eb   :  { %2480 = vrcp.f32 %v671_v16 }
 0x2f6   :  { %v2479_v18 = vpop.eup %2478 }
 0x2f7   :  { %v675_v20 = vmul.f32 %v2479_v18, %v674_v17  ;;  %v1938_v18 = vld [vmem:[%s3835_s0 + $0x50] sm:$0xff] }
 0x2f8   :  { %v2481_v22 = vpop.eup %2480 }
 0x2f9   :  { %v676_v21 = vadd.f32 %v1933_v19, %v675_v20  ;;  %v678_v23 = vsub.f32 1.0, %v2481_v22  ;;  %v680_v26 = vmul.f32 %v2481_v22, %v3051_v55  ;;  %v3363_v55 = vld [vmem:[%s3834_s1 + $0x50] sm:$0xff] }
 0x2fb   :  { %2482 = vtanh.f32 %v676_v21 }
 0x308   :  { %v2483_v24 = vpop.eup %2482 }
 0x309   :  { %v679_v25 = vmul.f32 %v2483_v24, %v678_v23 }
 0x30b   :  { %v3136_v27 = vadd.f32 %v680_v26, %v679_v25 }
 0x30d   :  { %1936 = vst [vmem:[%s3837_s5 + $0x10] sm:$0xff] %v3136_v27  ;;  %801 = vmatmul.mubr.f32.vlgmr.msra.gmra.mxu0 %v3136_v27  ;;  %2266 = vmatmul.mubr.f32.vlgmr.msra.gmra.mxu1 %v3136_v27 }
 0x30e   :  { %2269 = vmatpush3.msra.mxu1 %v2798_v33  ;;  %1017 = vmatprep.mubr.f32.mxu0 %v3852_v59  ;;  %v3184_v33 = vld [vmem:[%s3834_s1 + $0x138] sm:$0xff] }
 0x30f   :  { %2270 = vmatprep.subr.mxu1 %v3852_v59  ;;  %2300 = vmatprep.mubr.msk.f32.mxu1 %vm2536_vm0, %v3852_v59 }
 0x310   :  { %2271 = vmatpush3.msra.mxu1 %v2808_v34  ;;  %954 = vmatpush1.msra.mxu0 %v3160_v29  ;;  %v3189_v34 = vld [vmem:[%s3834_s1 + $0x148] sm:$0xff] }
 0x311   :  { %2272 = vmatprep.subr.mxu1 %v3852_v59  ;;  %955 = vmatprep.subr.mxu0 %v3166_v30 }
 0x312   :  { %956 = vmatpush1.msra.mxu0 %v3172_v31  ;;  %2273 = vmatpush3.msra.mxu1 %v3189_v34 }
 0x313   :  { %957 = vmatprep.subr.mxu0 %v3178_v32  ;;  %2274 = vmatprep.subr.mxu1 %v3852_v59 }
 0x314   :  { %958 = vmatpush1.msra.mxu0 %v3184_v33  ;;  %2275 = vmatpush3.msra.mxu1 %v3208_v37 }
 0x315   :  { %959 = vmatprep.subr.mxu0 %v3196_v35  ;;  %2276 = vmatprep.subr.mxu1 %v3852_v59 }
 0x316   :  { %960 = vmatpush1.msra.mxu0 %v3203_v36  ;;  %2277 = vmatpush3.msra.mxu1 %v3227_v40 }
 0x317   :  { %961 = vmatprep.subr.mxu0 %v3215_v38  ;;  %2278 = vmatprep.subr.mxu1 %v3852_v59 }
 0x318   :  { %962 = vmatpush1.msra.mxu0 %v3222_v39  ;;  %2279 = vmatpush3.msra.mxu1 %v3246_v43 }
 0x319   :  { %963 = vmatprep.subr.mxu0 %v3234_v41  ;;  %2280 = vmatprep.subr.mxu1 %v3852_v59 }
 0x31a   :  { %964 = vmatpush1.msra.mxu0 %v3241_v42  ;;  %2281 = vmatpush3.msra.mxu1 %v3265_v46 }
 0x31b   :  { %965 = vmatprep.subr.mxu0 %v3253_v44  ;;  %2282 = vmatprep.subr.mxu1 %v3852_v59 }
 0x31c   :  { %966 = vmatpush1.msra.mxu0 %v3260_v45  ;;  %2283 = vmatpush3.msra.mxu1 %v3284_v63 }
 0x31d   :  { %967 = vmatprep.subr.mxu0 %v3272_v47  ;;  %2284 = vmatprep.subr.mxu1 %v3852_v59 }
 0x31e   :  { %968 = vmatpush1.msra.mxu0 %v3279_v48  ;;  %2285 = vmatpush3.msra.mxu1 %v3301_v57 }
 0x31f   :  { %969 = vmatprep.subr.mxu0 %v3289_v0  ;;  %2286 = vmatprep.subr.mxu1 %v3852_v59 }
 0x320   :  { %970 = vmatpush1.msra.mxu0 %v3296_v56  ;;  %2287 = vmatpush3.msra.mxu1 %v3318_v62 }
 0x321   :  { %971 = vmatprep.subr.mxu0 %v3306_v58  ;;  %2288 = vmatprep.subr.mxu1 %v3852_v59 }
 0x322   :  { %972 = vmatpush1.msra.mxu0 %v3313_v61  ;;  %2289 = vmatpush3.msra.mxu1 %v3337_v51 }
 0x323   :  { %973 = vmatprep.subr.mxu0 %v3325_v49  ;;  %2290 = vmatprep.subr.mxu1 %v3852_v59 }
 0x324   :  { %974 = vmatpush1.msra.mxu0 %v3332_v50  ;;  %2291 = vmatpush3.msra.mxu1 %v3356_v54 }
 0x325   :  { %975 = vmatprep.subr.mxu0 %v3344_v52  ;;  %2292 = vmatprep.subr.mxu1 %v3852_v59 }
 0x326   :  { %976 = vmatpush1.msra.mxu0 %v3351_v53  ;;  %2293 = vmatpush3.msra.mxu1 %v3375_v2 }
 0x327   :  { %977 = vmatprep.subr.mxu0 %v3363_v55  ;;  %2294 = vmatprep.subr.mxu1 %v3852_v59 }
 0x328   :  { %978 = vmatpush1.msra.mxu0 %v3370_v1  ;;  %2295 = vmatpush3.msra.mxu1 %v3394_v5 }
 0x329   :  { %979 = vmatprep.subr.mxu0 %v3382_v3  ;;  %2296 = vmatprep.subr.mxu1 %v3852_v59 }
 0x32a   :  { %980 = vmatpush1.msra.mxu0 %v3389_v4  ;;  %2297 = vmatpush3.msra.mxu1 %v3413_v8 }
 0x32b   :  { %981 = vmatprep.subr.mxu0 %v3401_v6  ;;  %2298 = vmatprep.subr.mxu1 %v3852_v59 }
 0x32c   :  { %982 = vmatpush1.msra.mxu0 %v3408_v7  ;;  %2299 = vmatpush3.msra.mxu1 %v3432_v11 }
 0x32d   :  { %983 = vmatprep.subr.mxu0 %v3420_v9  ;;  %2303 = vmatprep.subr.mxu1 %v3852_v59 }
 0x32e   :  { %984 = vmatpush1.msra.mxu0 %v3427_v10 }
 0x32f   :  { %1170 = vmatprep.subr.mxu0 %v3154_v28 }
 0x3cd   :  { %v802_v13 = vpop.f32.mrf.mxu0  ;;  %v873_v14 = vpop.f32.mrf.mxu1 }
 0x3ce   :  { %v877_v15 = vadd.f32 %v1937_v12, %v802_v13  ;;  %v891_v26 = vadd.f32 %v2959_v60, %v873_v14  ;;  %v1939_v12 = vld [vmem:[%s3835_s0 + $0x58] sm:$0xff]  ;;  %v3858_v14 = vld [vmem:[#allocation5_spill] sm:$0xff] }
 0x3cf   :  { %v2267_v16 = vpop.f32.mrf.mxu1  ;;  %v804_v19 = vpop.f32.mrf.mxu0 }
 0x3d0   :  { %v1940_v17 = vmul.f32 -1.442695, %v877_v15  ;;  %v884_v20 = vadd.f32 %v1938_v18, %v804_v19 }
 0x3d2   :  { %2484 = vpow2.f32 %v1940_v17  ;;  %v1941_v21 = vmul.f32 -1.442695, %v884_v20 }
 0x3d4   :  { %2486 = vpow2.f32 %v1941_v21 }
 0x3df   :  { %v2485_v22 = vpop.eup %2484 }
 0x3e0   :  { %v881_v23 = vadd.f32 1.0, %v2485_v22  ;;  %v1943_v22 = vld [vmem:[%s3835_s0 + $0x60] sm:$0xff] }
 0x3e1   :  { %v2487_v24 = vpop.eup %2486 }
 0x3e2   :  { %2488 = vrcp.f32 %v881_v23  ;;  %v888_v25 = vadd.f32 1.0, %v2487_v24 }
 0x3e4   :  { %2490 = vrcp.f32 %v888_v25 }
 0x3ef   :  { %v2489_v11 = vpop.eup %2488 }
 0x3f0   :  { %v892_v13 = vmul.f32 %v2489_v11, %v891_v26  ;;  %v3506_v11 = vld [vmem:[%s3834_s1 + $0x160] sm:$0xff] }
 0x3f1   :  { %v2491_v16 = vpop.eup %2490 }
 0x3f2   :  { %v893_v15 = vadd.f32 %v1939_v12, %v892_v13  ;;  %v895_v17 = vsub.f32 1.0, %v2491_v16  ;;  %v897_v20 = vmul.f32 %v2491_v16, %v3136_v27  ;;  %v3499_v27 = vld [vmem:[%s3834_s1 + $0x178] sm:$0xff]  ;;  %v1944_v13 = vld [vmem:[%s3835_s0 + $0x68] sm:$0xff] }
 0x3f4   :  { %2492 = vtanh.f32 %v893_v15 }
 0x401   :  { %v2493_v18 = vpop.eup %2492 }
 0x402   :  { %v896_v19 = vmul.f32 %v2493_v18, %v895_v17 }
 0x404   :  { %v3453_v21 = vadd.f32 %v897_v20, %v896_v19 }
 0x406   :  { %1942 = vst [vmem:[%s3837_s5 + $0x18] sm:$0xff] %v3453_v21  ;;  %1018 = vmatmul.mubr.f32.vlgmr.msra.gmra.mxu0 %v3453_v21  ;;  %2301 = vmatmul.mubr.f32.vlgmr.msra.gmra.mxu1 %v3453_v21 }
 0x407   :  { %1171 = vmatpush1.msra.mxu0 %v3160_v29  ;;  %1234 = vmatprep.mubr.f32.mxu0 %v3852_v59 }
 0x408   :  { %1172 = vmatprep.subr.mxu0 %v3166_v30  ;;  %2335 = vmatprep.mubr.msk.f32.mxu1 %vm2536_vm0, %v3852_v59 }
 0x409   :  { %1173 = vmatpush1.msra.mxu0 %v3172_v31  ;;  %2304 = vmatpush3.msra.mxu1 %v3499_v27 }
 0x40a   :  { %1174 = vmatprep.subr.mxu0 %v3178_v32  ;;  %2305 = vmatprep.subr.mxu1 %v3852_v59 }
 0x40b   :  { %1175 = vmatpush1.msra.mxu0 %v3184_v33  ;;  %2306 = vmatpush3.msra.mxu1 %v3506_v11 }
 0x40c   :  { %1176 = vmatprep.subr.mxu0 %v3196_v35  ;;  %2307 = vmatprep.subr.mxu1 %v3852_v59 }
 0x40d   :  { %1177 = vmatpush1.msra.mxu0 %v3203_v36  ;;  %2308 = vmatpush3.msra.mxu1 %v3189_v34 }
 0x40e   :  { %1178 = vmatprep.subr.mxu0 %v3215_v38  ;;  %2309 = vmatprep.subr.mxu1 %v3852_v59 }
 0x40f   :  { %1179 = vmatpush1.msra.mxu0 %v3222_v39  ;;  %2310 = vmatpush3.msra.mxu1 %v3208_v37 }
 0x410   :  { %1180 = vmatprep.subr.mxu0 %v3234_v41  ;;  %2311 = vmatprep.subr.mxu1 %v3852_v59 }
 0x411   :  { %1181 = vmatpush1.msra.mxu0 %v3241_v42  ;;  %2312 = vmatpush3.msra.mxu1 %v3227_v40 }
 0x412   :  { %1182 = vmatprep.subr.mxu0 %v3253_v44  ;;  %2313 = vmatprep.subr.mxu1 %v3852_v59 }
 0x413   :  { %1183 = vmatpush1.msra.mxu0 %v3260_v45  ;;  %2314 = vmatpush3.msra.mxu1 %v3246_v43 }
 0x414   :  { %1184 = vmatprep.subr.mxu0 %v3272_v47  ;;  %2315 = vmatprep.subr.mxu1 %v3852_v59 }
 0x415   :  { %1185 = vmatpush1.msra.mxu0 %v3279_v48  ;;  %2316 = vmatpush3.msra.mxu1 %v3265_v46 }
 0x416   :  { %1186 = vmatprep.subr.mxu0 %v3289_v0  ;;  %2317 = vmatprep.subr.mxu1 %v3852_v59 }
 0x417   :  { %1187 = vmatpush1.msra.mxu0 %v3296_v56  ;;  %2318 = vmatpush3.msra.mxu1 %v3284_v63 }
 0x418   :  { %1188 = vmatprep.subr.mxu0 %v3306_v58  ;;  %2319 = vmatprep.subr.mxu1 %v3852_v59 }
 0x419   :  { %1189 = vmatpush1.msra.mxu0 %v3313_v61  ;;  %2320 = vmatpush3.msra.mxu1 %v3301_v57 }
 0x41a   :  { %1190 = vmatprep.subr.mxu0 %v3325_v49  ;;  %2321 = vmatprep.subr.mxu1 %v3852_v59 }
 0x41b   :  { %1191 = vmatpush1.msra.mxu0 %v3332_v50  ;;  %2322 = vmatpush3.msra.mxu1 %v3318_v62 }
 0x41c   :  { %1192 = vmatprep.subr.mxu0 %v3344_v52  ;;  %2323 = vmatprep.subr.mxu1 %v3852_v59 }
 0x41d   :  { %1193 = vmatpush1.msra.mxu0 %v3351_v53  ;;  %2324 = vmatpush3.msra.mxu1 %v3337_v51 }
 0x41e   :  { %1194 = vmatprep.subr.mxu0 %v3363_v55  ;;  %2325 = vmatprep.subr.mxu1 %v3852_v59 }
 0x41f   :  { %1195 = vmatpush1.msra.mxu0 %v3370_v1  ;;  %2326 = vmatpush3.msra.mxu1 %v3356_v54 }
 0x420   :  { %1196 = vmatprep.subr.mxu0 %v3382_v3  ;;  %2327 = vmatprep.subr.mxu1 %v3852_v59 }
 0x421   :  { %1197 = vmatpush1.msra.mxu0 %v3389_v4  ;;  %2328 = vmatpush3.msra.mxu1 %v3375_v2 }
 0x422   :  { %1198 = vmatprep.subr.mxu0 %v3401_v6  ;;  %2329 = vmatprep.subr.mxu1 %v3852_v59 }
 0x423   :  { %1199 = vmatpush1.msra.mxu0 %v3408_v7  ;;  %2330 = vmatpush3.msra.mxu1 %v3394_v5 }
 0x424   :  { %1200 = vmatprep.subr.mxu0 %v3420_v9  ;;  %2331 = vmatprep.subr.mxu1 %v3852_v59 }
 0x425   :  { %1201 = vmatpush1.msra.mxu0 %v3427_v10  ;;  %2332 = vmatpush3.msra.mxu1 %v3413_v8 }
 0x426   :  { %1387 = vmatprep.subr.mxu0 %v3154_v28  ;;  %2333 = vmatprep.subr.mxu1 %v3852_v59 }
 0x427   :  { %2334 = vmatpush3.msra.mxu1 %v3858_v14 }
 0x428   :  { %2338 = vmatprep.subr.mxu1 %v3852_v59 }
 0x4c6   :  { %v1019_v23 = vpop.f32.mrf.mxu0  ;;  %v1090_v24 = vpop.f32.mrf.mxu1 }
 0x4c7   :  { %v1094_v25 = vadd.f32 %v1943_v22, %v1019_v23  ;;  %v1108_v14 = vadd.f32 %v2959_v60, %v1090_v24  ;;  %v1945_v22 = vld [vmem:[%s3835_s0 + $0x70] sm:$0xff]  ;;  %v3859_v60 = vld [vmem:[#allocation4_spill] sm:$0xff] }
 0x4c8   :  { %v2302_v26 = vpop.f32.mrf.mxu1  ;;  %v1021_v15 = vpop.f32.mrf.mxu0 }
 0x4c9   :  { %v1946_v12 = vmul.f32 -1.442695, %v1094_v25  ;;  %v1101_v16 = vadd.f32 %v1944_v13, %v1021_v15 }
 0x4cb   :  { %2494 = vpow2.f32 %v1946_v12  ;;  %v1947_v17 = vmul.f32 -1.442695, %v1101_v16 }
 0x4cd   :  { %2496 = vpow2.f32 %v1947_v17 }
 0x4d8   :  { %v2495_v18 = vpop.eup %2494 }
 0x4d9   :  { %v1098_v19 = vadd.f32 1.0, %v2495_v18 }
 0x4da   :  { %v2497_v20 = vpop.eup %2496 }
 0x4db   :  { %2498 = vrcp.f32 %v1098_v19  ;;  %v1105_v28 = vadd.f32 1.0, %v2497_v20 }
 0x4dd   :  { %2500 = vrcp.f32 %v1105_v28  ;;  %v3860_v28 = vld [vmem:[#allocation5_spill] sm:$0xff] }
 0x4e8   :  { %v2499_v10 = vpop.eup %2498 }
 0x4e9   :  { %v1109_v23 = vmul.f32 %v2499_v10, %v1108_v14  ;;  %v3861_v10 = vld [vmem:[#allocation3_spill] sm:$0xff]  ;;  %v1949_v14 = vld [vmem:[%s3835_s0 + $0x78] sm:$0xff] }
 0x4ea   :  { %v2501_v26 = vpop.eup %2500 }
 0x4eb   :  { %v1110_v25 = vadd.f32 %v1945_v22, %v1109_v23  ;;  %v1112_v12 = vsub.f32 1.0, %v2501_v26  ;;  %v1114_v16 = vmul.f32 %v2501_v26, %v3453_v21  ;;  %v1950_v23 = vld [vmem:[%s3835_s0 + $0x80] sm:$0xff] }
 0x4ed   :  { %2502 = vtanh.f32 %v1110_v25 }
 0x4fa   :  { %v2503_v13 = vpop.eup %2502 }
 0x4fb   :  { %v1113_v15 = vmul.f32 %v2503_v13, %v1112_v12 }
 0x4fd   :  { %v3549_v17 = vadd.f32 %v1114_v16, %v1113_v15 }
 0x4ff   :  { %1948 = vst [vmem:[%s3837_s5 + $0x20] sm:$0xff] %v3549_v17  ;;  %1235 = vmatmul.mubr.f32.vlgmr.msra.gmra.mxu0 %v3549_v17  ;;  %2336 = vmatmul.mubr.f32.vlgmr.msra.gmra.mxu1 %v3549_v17 }
 0x500   :  { %1388 = vmatpush1.msra.mxu0 %v3160_v29  ;;  %2339 = vmatpush3.msra.mxu1 %v3499_v27 }
 0x501   :  { %1389 = vmatprep.subr.mxu0 %v3166_v30  ;;  %2340 = vmatprep.subr.mxu1 %v3852_v59 }
 0x502   :  { %1390 = vmatpush1.msra.mxu0 %v3172_v31  ;;  %2341 = vmatpush3.msra.mxu1 %v3506_v11 }
 0x503   :  { %1391 = vmatprep.subr.mxu0 %v3178_v32  ;;  %2342 = vmatprep.subr.mxu1 %v3852_v59 }
 0x504   :  { %1392 = vmatpush1.msra.mxu0 %v3184_v33  ;;  %2343 = vmatpush3.msra.mxu1 %v3189_v34 }
 0x505   :  { %1393 = vmatprep.subr.mxu0 %v3196_v35  ;;  %2344 = vmatprep.subr.mxu1 %v3852_v59 }
 0x506   :  { %1394 = vmatpush1.msra.mxu0 %v3203_v36  ;;  %2345 = vmatpush3.msra.mxu1 %v3208_v37 }
 0x507   :  { %1395 = vmatprep.subr.mxu0 %v3215_v38  ;;  %2346 = vmatprep.subr.mxu1 %v3852_v59 }
 0x508   :  { %1396 = vmatpush1.msra.mxu0 %v3222_v39  ;;  %2347 = vmatpush3.msra.mxu1 %v3227_v40 }
 0x509   :  { %1397 = vmatprep.subr.mxu0 %v3234_v41  ;;  %2348 = vmatprep.subr.mxu1 %v3852_v59 }
 0x50a   :  { %1398 = vmatpush1.msra.mxu0 %v3241_v42  ;;  %2349 = vmatpush3.msra.mxu1 %v3246_v43 }
 0x50b   :  { %1399 = vmatprep.subr.mxu0 %v3253_v44  ;;  %2350 = vmatprep.subr.mxu1 %v3852_v59 }
 0x50c   :  { %1400 = vmatpush1.msra.mxu0 %v3260_v45  ;;  %2351 = vmatpush3.msra.mxu1 %v3265_v46 }
 0x50d   :  { %1401 = vmatprep.subr.mxu0 %v3272_v47  ;;  %2352 = vmatprep.subr.mxu1 %v3852_v59 }
 0x50e   :  { %1402 = vmatpush1.msra.mxu0 %v3279_v48  ;;  %2353 = vmatpush3.msra.mxu1 %v3284_v63 }
 0x50f   :  { %1403 = vmatprep.subr.mxu0 %v3289_v0  ;;  %2354 = vmatprep.subr.mxu1 %v3852_v59 }
 0x510   :  { %1404 = vmatpush1.msra.mxu0 %v3296_v56  ;;  %2355 = vmatpush3.msra.mxu1 %v3301_v57 }
 0x511   :  { %1405 = vmatprep.subr.mxu0 %v3306_v58  ;;  %2356 = vmatprep.subr.mxu1 %v3852_v59 }
 0x512   :  { %1406 = vmatpush1.msra.mxu0 %v3313_v61  ;;  %2357 = vmatpush3.msra.mxu1 %v3318_v62 }
 0x513   :  { %1407 = vmatprep.subr.mxu0 %v3325_v49  ;;  %2358 = vmatprep.subr.mxu1 %v3852_v59 }
 0x514   :  { %1408 = vmatpush1.msra.mxu0 %v3332_v50  ;;  %2359 = vmatpush3.msra.mxu1 %v3337_v51 }
 0x515   :  { %1409 = vmatprep.subr.mxu0 %v3344_v52  ;;  %2360 = vmatprep.subr.mxu1 %v3852_v59 }
 0x516   :  { %1410 = vmatpush1.msra.mxu0 %v3351_v53  ;;  %2361 = vmatpush3.msra.mxu1 %v3356_v54 }
 0x517   :  { %1411 = vmatprep.subr.mxu0 %v3363_v55  ;;  %2362 = vmatprep.subr.mxu1 %v3852_v59 }
 0x518   :  { %1412 = vmatpush1.msra.mxu0 %v3370_v1  ;;  %2363 = vmatpush3.msra.mxu1 %v3375_v2 }
 0x519   :  { %1413 = vmatprep.subr.mxu0 %v3382_v3  ;;  %2364 = vmatprep.subr.mxu1 %v3852_v59 }
 0x51a   :  { %1414 = vmatpush1.msra.mxu0 %v3389_v4  ;;  %2365 = vmatpush3.msra.mxu1 %v3394_v5 }
 0x51b   :  { %1415 = vmatprep.subr.mxu0 %v3401_v6  ;;  %2366 = vmatprep.subr.mxu1 %v3852_v59 }
 0x51c   :  { %1416 = vmatpush1.msra.mxu0 %v3408_v7  ;;  %2367 = vmatpush3.msra.mxu1 %v3413_v8 }
 0x51d   :  { %1417 = vmatprep.subr.mxu0 %v3420_v9  ;;  %2368 = vmatprep.subr.mxu1 %v3852_v59 }
 0x51e   :  { %1418 = vmatpush1.msra.mxu0 %v3859_v60  ;;  %1451 = vmatprep.mubr.f32.mxu0 %v3852_v59 }
 0x51f   :  { %2369 = vmatpush3.msra.mxu1 %v3860_v28  ;;  %2370 = vmatprep.mubr.msk.f32.mxu1 %vm2536_vm0, %v3852_v59 }
 0x520   :  { %1604 = vmatprep.subr.mxu0 %v3861_v10  ;;  %2373 = vmatprep.subr.mxu1 %v3852_v59 }
 0x5bf   :  { %v1236_v24 = vpop.f32.mrf.mxu0  ;;  %v1307_v18 = vpop.f32.mrf.mxu1 }
 0x5c0   :  { %v1311_v19 = vadd.f32 %v1949_v14, %v1236_v24  ;;  %v3633_v14 = vld [vmem:[%s3836_s2] ss:$0 sm:$0xff] }
 0x5c1   :  { %v2337_v20 = vpop.f32.mrf.mxu1  ;;  %v1238_v25 = vpop.f32.mrf.mxu0  ;;  %v1325_v24 = vadd.f32 %v3633_v14, %v1307_v18 }
 0x5c2   :  { %v1952_v22 = vmul.f32 -1.442695, %v1311_v19  ;;  %v1318_v26 = vadd.f32 %v1950_v23, %v1238_v25  ;;  %v1951_v20 = vld [vmem:[%s3835_s0 + $0x88] sm:$0xff] }
 0x5c4   :  { %2504 = vpow2.f32 %v1952_v22  ;;  %v1953_v12 = vmul.f32 -1.442695, %v1318_v26 }
 0x5c6   :  { %2506 = vpow2.f32 %v1953_v12 }
 0x5d1   :  { %v2505_v13 = vpop.eup %2504 }
 0x5d2   :  { %v1315_v15 = vadd.f32 1.0, %v2505_v13 }
 0x5d3   :  { %v2507_v16 = vpop.eup %2506 }
 0x5d4   :  { %2508 = vrcp.f32 %v1315_v15  ;;  %v1322_v10 = vadd.f32 1.0, %v2507_v16 }
 0x5d6   :  { %2510 = vrcp.f32 %v1322_v10 }
 0x5e1   :  { %v2509_v19 = vpop.eup %2508 }
 0x5e2   :  { %v1326_v22 = vmul.f32 %v2509_v19, %v1325_v24  ;;  %v1962_v24 = vld [vmem:[%s3835_s0 + $0xb0] sm:$0xff] }
 0x5e3   :  { %v2511_v25 = vpop.eup %2510 }
 0x5e4   :  { %v1327_v23 = vadd.f32 %v1951_v20, %v1326_v22  ;;  %v1329_v26 = vsub.f32 1.0, %v2511_v25  ;;  %v1331_v15 = vmul.f32 %v2511_v25, %v3549_v17  ;;  %v1967_v25 = vld [vmem:[%s3839_s4] ss:$0 sm:$0xff] }
 0x5e6   :  { %2512 = vtanh.f32 %v1327_v23 }
 0x5f3   :  { %v2513_v12 = vpop.eup %2512 }
 0x5f4   :  { %v1330_v13 = vmul.f32 %v2513_v12, %v1329_v26 }
 0x5f6   :  { %v3640_v16 = vadd.f32 %v1331_v15, %v1330_v13 }
 0x5f8   :  { %1954 = vst [vmem:[%s3837_s5 + $0x28] sm:$0xff] %v3640_v16  ;;  %1452 = vmatmul.mubr.f32.vlgmr.msra.gmra.mxu0 %v3640_v16  ;;  %2371 = vmatmul.mubr.f32.vlgmr.msra.gmra.mxu1 %v3640_v16 }
 0x5f9   :  { %1605 = vmatpush1.msra.mxu0 %v3160_v29  ;;  %2374 = vmatpush3.msra.mxu1 %v3499_v27  ;;  %v1793_v29 = vld [vmem:[%s3838_s3 + $0x78] sm:$0xff]  ;;  %v1961_v27 = vld [vmem:[%s3835_s0 + $0xa8] sm:$0xff] }
 0x5fa   :  { %1606 = vmatprep.subr.mxu0 %v3166_v30  ;;  %2375 = vmatprep.subr.mxu1 %v3852_v59  ;;  %v1955_v30 = vld [vmem:[%s3835_s0 + $0x90] sm:$0xff] }
 0x5fb   :  { %1607 = vmatpush1.msra.mxu0 %v3172_v31  ;;  %2376 = vmatpush3.msra.mxu1 %v3506_v11 }
 0x5fc   :  { %1608 = vmatprep.subr.mxu0 %v3178_v32  ;;  %2377 = vmatprep.subr.mxu1 %v3852_v59 }
 0x5fd   :  { %1609 = vmatpush1.msra.mxu0 %v3184_v33  ;;  %2378 = vmatpush3.msra.mxu1 %v3189_v34 }
 0x5fe   :  { %1610 = vmatprep.subr.mxu0 %v3196_v35  ;;  %2379 = vmatprep.subr.mxu1 %v3852_v59 }
 0x5ff   :  { %1611 = vmatpush1.msra.mxu0 %v3203_v36  ;;  %2380 = vmatpush3.msra.mxu1 %v3208_v37  ;;  %v1956_v36 = vld [vmem:[%s3835_s0 + $0x98] sm:$0xff] }
 0x600   :  { %1612 = vmatprep.subr.mxu0 %v3215_v38  ;;  %2381 = vmatprep.subr.mxu1 %v3852_v59 }
 0x601   :  { %1613 = vmatpush1.msra.mxu0 %v3222_v39  ;;  %2382 = vmatpush3.msra.mxu1 %v3227_v40 }
 0x602   :  { %1614 = vmatprep.subr.mxu0 %v3234_v41  ;;  %2383 = vmatprep.subr.mxu1 %v3852_v59 }
 0x603   :  { %1615 = vmatpush1.msra.mxu0 %v3241_v42  ;;  %2384 = vmatpush3.msra.mxu1 %v3246_v43 }
 0x604   :  { %1616 = vmatprep.subr.mxu0 %v3253_v44  ;;  %2385 = vmatprep.subr.mxu1 %v3852_v59 }
 0x605   :  { %1617 = vmatpush1.msra.mxu0 %v3260_v45  ;;  %2386 = vmatpush3.msra.mxu1 %v3265_v46  ;;  %v1957_v45 = vld [vmem:[%s3835_s0 + $0xa0] sm:$0xff] }
 0x606   :  { %1618 = vmatprep.subr.mxu0 %v3272_v47  ;;  %2387 = vmatprep.subr.mxu1 %v3852_v59 }
 0x607   :  { %1619 = vmatpush1.msra.mxu0 %v3279_v48  ;;  %2388 = vmatpush3.msra.mxu1 %v3284_v63 }
 0x608   :  { %1620 = vmatprep.subr.mxu0 %v3289_v0  ;;  %2389 = vmatprep.subr.mxu1 %v3852_v59 }
 0x609   :  { %1621 = vmatpush1.msra.mxu0 %v3296_v56  ;;  %2390 = vmatpush3.msra.mxu1 %v3301_v57 }
 0x60a   :  { %1622 = vmatprep.subr.mxu0 %v3306_v58  ;;  %2391 = vmatprep.subr.mxu1 %v3852_v59 }
 0x60b   :  { %1623 = vmatpush1.msra.mxu0 %v3313_v61  ;;  %2392 = vmatpush3.msra.mxu1 %v3318_v62  ;;  %v1792_v61 = vld [vmem:[%s3838_s3 + $0x70] sm:$0xff]  ;;  %v1770_v62 = vld [vmem:[%s3837_s5] sm:$0xff] }
 0x60c   :  { %1624 = vmatprep.subr.mxu0 %v3325_v49  ;;  %2393 = vmatprep.subr.mxu1 %v3852_v59  ;;  %v1791_v49 = vld [vmem:[%s3838_s3 + $0x68] sm:$0xff] }
 0x60d   :  { %1625 = vmatpush1.msra.mxu0 %v3332_v50  ;;  %2394 = vmatpush3.msra.mxu1 %v3337_v51  ;;  %v1790_v50 = vld [vmem:[%s3838_s3 + $0x60] sm:$0xff]  ;;  %v1789_v51 = vld [vmem:[%s3838_s3 + $0x58] sm:$0xff] }
 0x60e   :  { %1626 = vmatprep.subr.mxu0 %v3344_v52  ;;  %2395 = vmatprep.subr.mxu1 %v3852_v59  ;;  %v1788_v52 = vld [vmem:[%s3838_s3 + $0x50] sm:$0xff] }
 0x60f   :  { %1627 = vmatpush1.msra.mxu0 %v3351_v53  ;;  %2396 = vmatpush3.msra.mxu1 %v3356_v54  ;;  %v1787_v53 = vld [vmem:[%s3838_s3 + $0x48] sm:$0xff]  ;;  %v1786_v54 = vld [vmem:[%s3838_s3 + $0x40] sm:$0xff] }
 0x610   :  { %1628 = vmatprep.subr.mxu0 %v3363_v55  ;;  %2397 = vmatprep.subr.mxu1 %v3852_v59  ;;  %v1785_v55 = vld [vmem:[%s3838_s3 + $0x38] sm:$0xff] }
 0x611   :  { %1629 = vmatpush1.msra.mxu0 %v3370_v1  ;;  %2398 = vmatpush3.msra.mxu1 %v3375_v2  ;;  %v1784_v1 = vld [vmem:[%s3838_s3 + $0x30] sm:$0xff]  ;;  %v1783_v2 = vld [vmem:[%s3838_s3 + $0x28] sm:$0xff] }
 0x612   :  { %1630 = vmatprep.subr.mxu0 %v3382_v3  ;;  %2399 = vmatprep.subr.mxu1 %v3852_v59  ;;  %v1782_v3 = vld [vmem:[%s3838_s3 + $0x20] sm:$0xff] }
 0x613   :  { %1631 = vmatpush1.msra.mxu0 %v3389_v4  ;;  %2400 = vmatpush3.msra.mxu1 %v3394_v5  ;;  %v1781_v4 = vld [vmem:[%s3838_s3 + $0x18] sm:$0xff]  ;;  %v1780_v5 = vld [vmem:[%s3838_s3 + $0x10] sm:$0xff] }
 0x614   :  { %1632 = vmatprep.subr.mxu0 %v3401_v6  ;;  %2401 = vmatprep.subr.mxu1 %v3852_v59  ;;  %v1779_v6 = vld [vmem:[%s3838_s3 + $0x8] sm:$0xff] }
 0x615   :  { %1633 = vmatpush1.msra.mxu0 %v3408_v7  ;;  %2402 = vmatpush3.msra.mxu1 %v3413_v8  ;;  %v1778_v7 = vld [vmem:[%s3838_s3] sm:$0xff]  ;;  %v1771_v8 = vld [vmem:[%s3837_s5 + $0x8] sm:$0xff] }
 0x616   :  { %1634 = vmatprep.subr.mxu0 %v3420_v9  ;;  %2403 = vmatprep.subr.mxu1 %v3852_v59  ;;  %v1772_v9 = vld [vmem:[%s3837_s5 + $0x10] sm:$0xff] }
 0x617   :  { %1635 = vmatpush1.msra.mxu0 %v3859_v60  ;;  %1668 = vmatprep.mubr.f32.mxu0 %v3852_v59 }
 0x618   :  { %2404 = vmatpush3.msra.mxu1 %v3860_v28  ;;  %2405 = vmatprep.mubr.msk.f32.mxu1 %vm2536_vm0, %v3852_v59 }
 0x619   :  { %2408 = vmatprep.subr.mxu0 %v1793_v29 }
 0x6b8   :  { %v1453_v31 = vpop.f32.mrf.mxu0  ;;  %v1524_v32 = vpop.f32.mrf.mxu1 }
 0x6b9   :  { %v1528_v33 = vadd.f32 %v1955_v30, %v1453_v31  ;;  %v1542_v43 = vadd.f32 %v3633_v14, %v1524_v32 }
 0x6ba   :  { %v2372_v34 = vpop.f32.mrf.mxu1  ;;  %v1455_v37 = vpop.f32.mrf.mxu0 }
 0x6bb   :  { %v1958_v35 = vmul.f32 -1.442695, %v1528_v33  ;;  %v1535_v59 = vadd.f32 %v1956_v36, %v1455_v37 }
 0x6bd   :  { %2514 = vpow2.f32 %v1958_v35  ;;  %v1959_v38 = vmul.f32 -1.442695, %v1535_v59 }
 0x6bf   :  { %2516 = vpow2.f32 %v1959_v38 }
 0x6ca   :  { %v2515_v39 = vpop.eup %2514 }
 0x6cb   :  { %v1532_v40 = vadd.f32 1.0, %v2515_v39 }
 0x6cc   :  { %v2517_v41 = vpop.eup %2516 }
 0x6cd   :  { %2518 = vrcp.f32 %v1532_v40  ;;  %v1539_v42 = vadd.f32 1.0, %v2517_v41 }
 0x6cf   :  { %2520 = vrcp.f32 %v1539_v42 }
 0x6da   :  { %v2519_v44 = vpop.eup %2518 }
 0x6db   :  { %v1543_v46 = vmul.f32 %v2519_v44, %v1542_v43 }
 0x6dc   :  { %v2521_v48 = vpop.eup %2520 }
 0x6dd   :  { %v1544_v47 = vadd.f32 %v1957_v45, %v1543_v46  ;;  %v1546_v63 = vsub.f32 1.0, %v2521_v48  ;;  %v1548_v57 = vmul.f32 %v2521_v48, %v3640_v16 }
 0x6df   :  { %2522 = vtanh.f32 %v1544_v47 }
 0x6ec   :  { %v2523_v0 = vpop.eup %2522 }
 0x6ed   :  { %v1547_v56 = vmul.f32 %v2523_v0, %v1546_v63 }
 0x6ef   :  { %v3727_v58 = vadd.f32 %v1548_v57, %v1547_v56 }
 0x6f1   :  { %1960 = vst [vmem:[%s3837_s5 + $0x30] sm:$0xff] %v3727_v58  ;;  %1669 = vmatmul.mubr.f32.vlgmr.msra.gmra.mxu0 %v3727_v58  ;;  %2406 = vmatmul.mubr.f32.vlgmr.msra.gmra.mxu1 %v3727_v58 }
 0x6f2   :  { %2409 = vmatpush3.msra.mxu0 %v1793_v29  ;;  %2440 = vmatprep.mubr.f32.mxu0 %v1770_v62  ;;  %v1963_v29 = vld [vmem:[%s3835_s0 + $0xb8] sm:$0xff] }
 0x6f3   :  { %2410 = vmatprep.subr.mxu0 %v1792_v61 }
 0x6f4   :  { %2411 = vmatpush3.msra.mxu0 %v1792_v61 }
 0x6f5   :  { %2412 = vmatprep.subr.mxu0 %v1791_v49 }
 0x6f6   :  { %2413 = vmatpush3.msra.mxu0 %v1791_v49 }
 0x6f7   :  { %2414 = vmatprep.subr.mxu0 %v1790_v50 }
 0x6f8   :  { %2415 = vmatpush3.msra.mxu0 %v1790_v50 }
 0x6f9   :  { %2416 = vmatprep.subr.mxu0 %v1789_v51 }
 0x6fa   :  { %2417 = vmatpush3.msra.mxu0 %v1789_v51 }
 0x6fb   :  { %2418 = vmatprep.subr.mxu0 %v1788_v52 }
 0x6fc   :  { %2419 = vmatpush3.msra.mxu0 %v1788_v52 }
 0x6fd   :  { %2420 = vmatprep.subr.mxu0 %v1787_v53 }
 0x6fe   :  { %2421 = vmatpush3.msra.mxu0 %v1787_v53 }
 0x6ff   :  { %2422 = vmatprep.subr.mxu0 %v1786_v54 }
 0x700   :  { %2423 = vmatpush3.msra.mxu0 %v1786_v54 }
 0x701   :  { %2424 = vmatprep.subr.mxu0 %v1785_v55 }
 0x702   :  { %2425 = vmatpush3.msra.mxu0 %v1785_v55 }
 0x703   :  { %2426 = vmatprep.subr.mxu0 %v1784_v1 }
 0x704   :  { %2427 = vmatpush3.msra.mxu0 %v1784_v1 }
 0x705   :  { %2428 = vmatprep.subr.mxu0 %v1783_v2 }
 0x706   :  { %2429 = vmatpush3.msra.mxu0 %v1783_v2 }
 0x707   :  { %2430 = vmatprep.subr.mxu0 %v1782_v3 }
 0x708   :  { %2431 = vmatpush3.msra.mxu0 %v1782_v3 }
 0x709   :  { %2432 = vmatprep.subr.mxu0 %v1781_v4 }
 0x70a   :  { %2433 = vmatpush3.msra.mxu0 %v1781_v4 }
 0x70b   :  { %2434 = vmatprep.subr.mxu0 %v1780_v5 }
 0x70c   :  { %2435 = vmatpush3.msra.mxu0 %v1780_v5 }
 0x70d   :  { %2436 = vmatprep.subr.mxu0 %v1779_v6 }
 0x70e   :  { %2437 = vmatpush3.msra.mxu0 %v1779_v6 }
 0x70f   :  { %2438 = vmatprep.subr.mxu0 %v1778_v7 }
 0x710   :  { %2439 = vmatpush3.msra.mxu0 %v1778_v7 }
 0x711   :  { %2441 = vmatmul.mubr.f32.vlgmr.msra.gmra.mxu0 %v1771_v8 }
 0x712   :  { %2443 = vmatprep.mubr.f32.mxu0 %v1772_v9 }
 0x715   :  { %2444 = vmatmul.mubr.f32.gmra.mxu0 %v3453_v21 }
 0x716   :  { %2446 = vmatprep.mubr.f32.mxu0 %v3549_v17 }
 0x719   :  { %2447 = vmatmul.mubr.f32.gmra.mxu0 %v3640_v16 }
 0x71a   :  { %2449 = vmatprep.mubr.f32.mxu0 %v3727_v58 }
 0x7b1   :  { %v1670_v11 = vpop.f32.mrf.mxu0  ;;  %v1741_v60 = vpop.f32.mrf.mxu1 }
 0x7b2   :  { %v1745_v28 = vadd.f32 %v1961_v27, %v1670_v11  ;;  %v1759_v13 = vadd.f32 %v3633_v14, %v1741_v60 }
 0x7b3   :  { %v2407_v18 = vpop.f32.mrf.mxu1  ;;  %v1672_v21 = vpop.f32.mrf.mxu0 }
 0x7b4   :  { %v1964_v10 = vmul.f32 -1.442695, %v1745_v28  ;;  %v1752_v17 = vadd.f32 %v1962_v24, %v1672_v21 }
 0x7b6   :  { %2524 = vpow2.f32 %v1964_v10  ;;  %v1965_v19 = vmul.f32 -1.442695, %v1752_v17 }
 0x7b8   :  { %2526 = vpow2.f32 %v1965_v19 }
 0x7c3   :  { %v2525_v20 = vpop.eup %2524 }
 0x7c4   :  { %v1749_v22 = vadd.f32 1.0, %v2525_v20 }
 0x7c5   :  { %v2527_v23 = vpop.eup %2526 }
 0x7c6   :  { %2528 = vrcp.f32 %v1749_v22  ;;  %v1756_v26 = vadd.f32 1.0, %v2527_v23 }
 0x7c8   :  { %2530 = vrcp.f32 %v1756_v26 }
 0x7d1   :  { %v2442_v12 = vpop.f32.mrf.mxu0 }
 0x7d2   :  { %v1873_v15 = vadd.f32 %v2442_v12, %v1967_v25 }
 0x7d3   :  { %v2529_v16 = vpop.eup %2528  ;;  %v1867_v30 = vpop.f32.mrf.mxu0 }
 0x7d4   :  { %v1760_v31 = vmul.f32 %v2529_v16, %v1759_v13  ;;  %1907 = vst [vmem:[%s3840_s6 + $0x8] sm:$0xff] %v1873_v15  ;;  %v1868_v32 = vadd.f32 %v1967_v25, %v1867_v30 }
 0x7d5   :  { %v2445_v33 = vpop.f32.mrf.mxu0  ;;  %v2531_v40 = vpop.eup %2530 }
 0x7d6   :  { %v1761_v34 = vadd.f32 %v1963_v29, %v1760_v31  ;;  %1906 = vst [vmem:[%s3840_s6] sm:$0xff] %v1868_v32  ;;  %v1883_v14 = vadd.f32 %v2445_v33, %v1967_v25  ;;  %v1763_v41 = vsub.f32 1.0, %v2531_v40  ;;  %v1765_v44 = vmul.f32 %v2531_v40, %v3727_v58 }
 0x7d7   :  { %v1877_v35 = vpop.f32.mrf.mxu0 }
 0x7d8   :  { %2532 = vtanh.f32 %v1761_v34  ;;  %1909 = vst [vmem:[%s3840_s6 + $0x18] sm:$0xff] %v1883_v14  ;;  %v1878_v36 = vadd.f32 %v1967_v25, %v1877_v35 }
 0x7d9   :  { %v2448_v37 = vpop.f32.mrf.mxu0 }
 0x7da   :  { %1908 = vst [vmem:[%s3840_s6 + $0x10] sm:$0xff] %v1878_v36  ;;  %v1893_v59 = vadd.f32 %v2448_v37, %v1967_v25 }
 0x7db   :  { %v1887_v38 = vpop.f32.mrf.mxu0 }
 0x7dc   :  { %1911 = vst [vmem:[%s3840_s6 + $0x28] sm:$0xff] %v1893_v59  ;;  %v1888_v39 = vadd.f32 %v1967_v25, %v1887_v38 }
 0x7de   :  { %1910 = vst [vmem:[%s3840_s6 + $0x20] sm:$0xff] %v1888_v39 }
 0x7e5   :  { %v2533_v42 = vpop.eup %2532 }
 0x7e6   :  { %v1764_v43 = vmul.f32 %v2533_v42, %v1763_v41 }
 0x7e8   :  { %v1766_v45 = vadd.f32 %v1765_v44, %v1764_v43 }
 0x7ea   :  { %1966 = vst [vmem:[%s3837_s5 + $0x38] sm:$0xff] %v1766_v45  ;;  %2450 = vmatmul.mubr.f32.gmra.mxu0 %v1766_v45 }
 0x8aa   :  { %v2451_v46 = vpop.f32.mrf.mxu0 }
 0x8ab   :  { %v1903_v47 = vadd.f32 %v2451_v46, %v1967_v25 }
 0x8ac   :  { %v1897_v48 = vpop.f32.mrf.mxu0 }
 0x8ad   :  { %1913 = vst [vmem:[%s3840_s6 + $0x38] sm:$0xff] %v1903_v47  ;;  %v1898_v63 = vadd.f32 %v1967_v25, %v1897_v48 }
 0x8af   :  { %1912 = vst [vmem:[%s3840_s6 + $0x30] sm:$0xff] %v1898_v63 }

</bundles_post_ra>
